<compile_context>
chip_gen: v6e
topology: v6e:2x2x1
jax: 0.10.0
libtpu: 0.0.40
codegen_flags: <defaults>
</compile_context>

<pallas_src>
import jax
import jax.numpy as jnp
from jax.experimental import pallas as pl
from jax.experimental.pallas import tpu as pltpu


def _conv_bn_relu_kernel(x_ref, w_ref, shift_ref, out_ref, patch_ref):
    """One batch element per grid step.

    x_ref:     (1, Ho+1, 2*(Wo+1), 2*Cin)  padded image, parity-folded layout
    w_ref:     (9*Cin, Cout)               conv weight with BN scale folded in,
                                           row order (kh, kw, ci)
    shift_ref: (1, Cout)                   folded BN shift (beta - mean*scale), f32
    out_ref:   (1, Ho*Wo, Cout)            f32 output
    patch_ref: (Ho*Wo, 9*Cin)              VMEM scratch im2col matrix (never in HBM)
    """
    _, hq, wp2, c2 = x_ref.shape
    cin = c2 // 2
    wq = wp2 // 2
    ho_n, wo_n = hq - 1, wq - 1

    # ---- fused im2col: gather the 9 taps straight from VMEM into the patch scratch.
    # Folded layout: element (q, s*Wq + p, t*Cin + ci) == x_pad[2*q + s, 2*p + t, ci].
    # Tap (kh, kw) of output (ho, wo) reads padded pixel (2*ho + kh, 2*wo + kw).
    for ho in range(ho_n):
        r0 = ho * wo_n
        for kh, (dq, s) in enumerate(((0, 0), (0, 1), (1, 0))):  # kh -> (q offset, s)
            q = ho + dq
            u0 = s * wq
            c0 = kh * 3 * cin
            # kw = 0, 1 : pair columns [0, Wo), all 2*Cin lanes
            patch_ref[r0:r0 + wo_n, c0:c0 + 2 * cin] = x_ref[0, q, u0:u0 + wo_n, :]
            # kw = 2   : pair columns [1, Wo + 1), first Cin lanes
            patch_ref[r0:r0 + wo_n, c0 + 2 * cin:c0 + 3 * cin] = (
                x_ref[0, q, u0 + 1:u0 + 1 + wo_n, 0:cin])

    # ---- conv as a single MXU matmul, f32 accumulate, folded-BN shift + ReLU in f32.
    acc = jnp.dot(patch_ref[...], w_ref[...], preferred_element_type=jnp.float32)
    y = jnp.maximum(acc + shift_ref[...], 0.0)
    out_ref[0] = y.astype(out_ref.dtype)


def downsample_forward(x, weight, gamma, beta, running_mean, running_var,
                       eps=1e-5, compute_dtype=jnp.bfloat16):
    """Conv2d(3x3, stride=2, pad=1, no bias) -> BatchNorm2d (eval) -> ReLU.

    x: [N, C, H, W] float32 (NCHW, like PyTorch).  Returns [N, Cout, Ho, Wo] float32.
    """
    N, Cin, H, W = x.shape
    Cout = weight.shape[0]
    Ho = (H - 1) // 2 + 1          # (H + 2*1 - 3)//2 + 1
    Wo = (W - 1) // 2 + 1
    Hq, Wq = Ho + 1, Wo + 1        # halves of the even-padded spatial dims

    # -- glue: NCHW -> NHWC, zero-pad to (2*Hq, 2*Wq), then a FREE row-major reshape
    #    folding row/col parity into the trailing dims (makes every conv tap a plain
    #    static slice in the kernel; no HBM im2col).
    x_nhwc = jnp.transpose(x, (0, 2, 3, 1))
    x_pad = jnp.pad(x_nhwc, ((0, 0), (1, 2 * Hq - H - 1), (1, 2 * Wq - W - 1), (0, 0)))
    xr = x_pad.reshape(N, Hq, 2 * Wq, 2 * Cin).astype(compute_dtype)

    # -- fold BatchNorm (eval mode) into a per-output-channel weight scale + shift.
    #    TODO(synk): train-mode BN (batch statistics) would need a batch-wide reduction pass.
    scale = (gamma / jnp.sqrt(running_var + eps)).astype(jnp.float32)
    shift = (beta - running_mean * scale).astype(jnp.float32).reshape(1, Cout)
    w_folded = weight.astype(jnp.float32) * scale[:, None, None, None]     # [Cout,Cin,3,3]
    w_mat = jnp.transpose(w_folded, (2, 3, 1, 0)).reshape(9 * Cin, Cout)   # (kh,kw,ci) rows
    w_mat = w_mat.astype(compute_dtype)

    in_bytes = jnp.dtype(compute_dtype).itemsize
    x_blk = Hq * (2 * Wq) * (2 * Cin) * in_bytes
    out_blk = Ho * Wo * Cout * 4
    patch_b = Ho * Wo * 9 * Cin * in_bytes
    w_bytes = 9 * Cin * Cout * in_bytes
    vmem_need = 2 * x_blk + 2 * out_blk + patch_b + w_bytes + Cout * 4
    # TODO(synk): for very large H*W*C, add a second grid axis over output-row tiles
    # (needs a 1-row overlapping slab via pl.Element or a manual DMA) to bound the
    # per-step VMEM footprint; unnecessary at ResNet-scale feature-map sizes.

    cost = pl.CostEstimate(
        flops=2 * N * Ho * Wo * 9 * Cin * Cout,
        bytes_accessed=(xr.size * in_bytes + w_mat.size * in_bytes
                        + N * Ho * Wo * Cout * 4 + Cout * 4),
        transcendentals=0,
    )

    out = pl.pallas_call(
        _conv_bn_relu_kernel,
        out_shape=jax.ShapeDtypeStruct((N, Ho * Wo, Cout), jnp.float32),
        grid_spec=pltpu.PrefetchScalarGridSpec(
            num_scalar_prefetch=0,
            grid=(N,),   # one whole image per step; >=2 parallel steps keeps both v7x TCs busy
            in_specs=[
                pl.BlockSpec((1, Hq, 2 * Wq, 2 * Cin), lambda n: (n, 0, 0, 0)),
                pl.BlockSpec((9 * Cin, Cout), lambda n: (0, 0)),
                pl.BlockSpec((1, Cout), lambda n: (0, 0)),
            ],
            out_specs=pl.BlockSpec((1, Ho * Wo, Cout), lambda n: (n, 0, 0)),
            scratch_shapes=[pltpu.VMEM((Ho * Wo, 9 * Cin), compute_dtype)],
        ),
        compiler_params=pltpu.CompilerParams(
            dimension_semantics=("parallel",),
            vmem_limit_bytes=int(min(64 * 2**20, max(32 * 2**20, 2 * vmem_need))),
        ),
        cost_estimate=cost,
    )(xr, w_mat, shift)

    # free reshape + layout transpose back to PyTorch NCHW
    return jnp.transpose(out.reshape(N, Ho, Wo, Cout), (0, 3, 1, 2))


if __name__ == "__main__":
    key = jax.random.PRNGKey(0)
    kx, kw = jax.random.split(key)

    N, C, H, W = 2, 4, 16, 16
    x = jax.random.normal(kx, (N, C, H, W), dtype=jnp.float32)

    # Deterministic parameters (conv weight w/o bias + BN eval-mode stats)
    weight = 0.1 * jax.random.normal(kw, (C, C, 3, 3), dtype=jnp.float32)
    gamma = 1.0 + 0.1 * jnp.arange(C, dtype=jnp.float32)
    beta = 0.05 * jnp.arange(C, dtype=jnp.float32)
    running_mean = 0.01 * jnp.arange(C, dtype=jnp.float32)
    running_var = 1.0 + 0.02 * jnp.arange(C, dtype=jnp.float32)
    eps = 1e-5

    out = downsample_forward(x, weight, gamma, beta, running_mean, running_var, eps=eps)
    out = jax.block_until_ready(out)

    # ---- references -------------------------------------------------------------
    scale = gamma / jnp.sqrt(running_var + eps)
    shift = beta - running_mean * scale
    w_folded = weight * scale[:, None, None, None]

    def conv_shift_relu(xi, wi):
        y = jax.lax.conv_general_dilated(
            xi, wi, window_strides=(2, 2), padding=((1, 1), (1, 1)),
            dimension_numbers=("NCHW", "OIHW", "NCHW"),
            precision=jax.lax.Precision.HIGHEST)
        return jnp.maximum(y + shift[None, :, None, None], 0.0)

    # (1) matched-precision reference: same bf16 rounding of inputs / folded weights
    x_bf = x.astype(jnp.bfloat16).astype(jnp.float32)
    w_bf = w_folded.astype(jnp.bfloat16).astype(jnp.float32)
    ref_matched = conv_shift_relu(x_bf, w_bf)
    # (2) full-f32 semantic reference (PyTorch eval-mode Conv -> BN -> ReLU)
    ref_f32 = conv_shift_relu(x, w_folded)

    Ho, Wo = (H + 1) // 2, (W + 1) // 2
    assert out.shape == (N, C, Ho, Wo)
    assert jnp.allclose(out, ref_matched, atol=2e-3, rtol=2e-3)
    assert jnp.allclose(out, ref_f32, atol=5e-2, rtol=5e-2)
    print("KERNEL_OK")
</pallas_src>

<mosaic_0001>
module attributes {stable_mosaic.version = 11 : i64} {
  func.func @_conv_bn_relu_kernel(%arg0: i32, %arg1: memref<1x9x18x8xbf16, #tpu.memory_space<vmem>>, %arg2: memref<36x4xbf16, #tpu.memory_space<vmem>>, %arg3: memref<1x4xf32, #tpu.memory_space<vmem>>, %arg4: memref<1x64x4xf32, #tpu.memory_space<vmem>>, %arg5: memref<64x36xbf16, #tpu.memory_space<vmem>>) attributes {dimension_semantics = [#tpu.dimension_semantics<parallel>], iteration_bounds = array<i64: 2>, scalar_prefetch = 0 : i64, scratch_operands = 1 : i64, tpu.core_type = #tpu.core_type<tc>, window_params = [{transform_indices = @transform_0, window_bounds = array<i64: 1, 9, 18, 8>}, {pipeline_mode = #tpu.pipeline_mode<synchronous>, transform_indices = @transform_1, window_bounds = array<i64: 36, 4>}, {pipeline_mode = #tpu.pipeline_mode<synchronous>, transform_indices = @transform_2, window_bounds = array<i64: 1, 4>}, {transform_indices = @transform_3, window_bounds = array<i64: 1, 64, 4>}]} {
    %c0 = arith.constant 0 : index
    %c0_0 = arith.constant 0 : index
    %c0_1 = arith.constant 0 : index
    %c0_2 = arith.constant 0 : index
    %0 = vector.load %arg1[%c0, %c0_0, %c0_1, %c0_2] : memref<1x9x18x8xbf16, #tpu.memory_space<vmem>>, vector<1x1x8x8xbf16>
    %1 = vector.shape_cast %0 : vector<1x1x8x8xbf16> to vector<8x8xbf16>
    %c0_3 = arith.constant 0 : index
    %c0_4 = arith.constant 0 : index
    %2 = vector.load %arg5[%c0_3, %c0_4] : memref<64x36xbf16, #tpu.memory_space<vmem>>, vector<8x8xbf16>
    tpu.vector_store %arg5[%c0_3, %c0_4], %1 {strides = array<i32>} : memref<64x36xbf16, #tpu.memory_space<vmem>>, vector<8x8xbf16>,
    %c0_5 = arith.constant 0 : index
    %c0_6 = arith.constant 0 : index
    %c1 = arith.constant 1 : index
    %c0_7 = arith.constant 0 : index
    %3 = vector.load %arg1[%c0_5, %c0_6, %c1, %c0_7] : memref<1x9x18x8xbf16, #tpu.memory_space<vmem>>, vector<1x1x8x4xbf16>
    %4 = vector.shape_cast %3 : vector<1x1x8x4xbf16> to vector<8x4xbf16>
    %c0_8 = arith.constant 0 : index
    %c8 = arith.constant 8 : index
    %5 = vector.load %arg5[%c0_8, %c8] : memref<64x36xbf16, #tpu.memory_space<vmem>>, vector<8x4xbf16>
    tpu.vector_store %arg5[%c0_8, %c8], %4 {strides = array<i32>} : memref<64x36xbf16, #tpu.memory_space<vmem>>, vector<8x4xbf16>,
    %c0_9 = arith.constant 0 : index
    %c0_10 = arith.constant 0 : index
    %c9 = arith.constant 9 : index
    %c0_11 = arith.constant 0 : index
    %6 = vector.load %arg1[%c0_9, %c0_10, %c9, %c0_11] : memref<1x9x18x8xbf16, #tpu.memory_space<vmem>>, vector<1x1x8x8xbf16>
    %7 = vector.shape_cast %6 : vector<1x1x8x8xbf16> to vector<8x8xbf16>
    %c0_12 = arith.constant 0 : index
    %c12 = arith.constant 12 : index
    %8 = vector.load %arg5[%c0_12, %c12] : memref<64x36xbf16, #tpu.memory_space<vmem>>, vector<8x8xbf16>
    tpu.vector_store %arg5[%c0_12, %c12], %7 {strides = array<i32>} : memref<64x36xbf16, #tpu.memory_space<vmem>>, vector<8x8xbf16>,
    %c0_13 = arith.constant 0 : index
    %c0_14 = arith.constant 0 : index
    %c10 = arith.constant 10 : index
    %c0_15 = arith.constant 0 : index
    %9 = vector.load %arg1[%c0_13, %c0_14, %c10, %c0_15] : memref<1x9x18x8xbf16, #tpu.memory_space<vmem>>, vector<1x1x8x4xbf16>
    %10 = vector.shape_cast %9 : vector<1x1x8x4xbf16> to vector<8x4xbf16>
    %c0_16 = arith.constant 0 : index
    %c20 = arith.constant 20 : index
    %11 = vector.load %arg5[%c0_16, %c20] : memref<64x36xbf16, #tpu.memory_space<vmem>>, vector<8x4xbf16>
    tpu.vector_store %arg5[%c0_16, %c20], %10 {strides = array<i32>} : memref<64x36xbf16, #tpu.memory_space<vmem>>, vector<8x4xbf16>,
    %c0_17 = arith.constant 0 : index
    %c1_18 = arith.constant 1 : index
    %c0_19 = arith.constant 0 : index
    %c0_20 = arith.constant 0 : index
    %12 = vector.load %arg1[%c0_17, %c1_18, %c0_19, %c0_20] : memref<1x9x18x8xbf16, #tpu.memory_space<vmem>>, vector<1x1x8x8xbf16>
    %13 = vector.shape_cast %12 : vector<1x1x8x8xbf16> to vector<8x8xbf16>
    %c0_21 = arith.constant 0 : index
    %c24 = arith.constant 24 : index
    %14 = vector.load %arg5[%c0_21, %c24] : memref<64x36xbf16, #tpu.memory_space<vmem>>, vector<8x8xbf16>
    tpu.vector_store %arg5[%c0_21, %c24], %13 {strides = array<i32>} : memref<64x36xbf16, #tpu.memory_space<vmem>>, vector<8x8xbf16>,
    %c0_22 = arith.constant 0 : index
    %c1_23 = arith.constant 1 : index
    %c1_24 = arith.constant 1 : index
    %c0_25 = arith.constant 0 : index
    %15 = vector.load %arg1[%c0_22, %c1_23, %c1_24, %c0_25] : memref<1x9x18x8xbf16, #tpu.memory_space<vmem>>, vector<1x1x8x4xbf16>
    %16 = vector.shape_cast %15 : vector<1x1x8x4xbf16> to vector<8x4xbf16>
    %c0_26 = arith.constant 0 : index
    %c32 = arith.constant 32 : index
    %17 = vector.load %arg5[%c0_26, %c32] : memref<64x36xbf16, #tpu.memory_space<vmem>>, vector<8x4xbf16>
    tpu.vector_store %arg5[%c0_26, %c32], %16 {strides = array<i32>} : memref<64x36xbf16, #tpu.memory_space<vmem>>, vector<8x4xbf16>,
    %c0_27 = arith.constant 0 : index
    %c1_28 = arith.constant 1 : index
    %c0_29 = arith.constant 0 : index
    %c0_30 = arith.constant 0 : index
    %18 = vector.load %arg1[%c0_27, %c1_28, %c0_29, %c0_30] : memref<1x9x18x8xbf16, #tpu.memory_space<vmem>>, vector<1x1x8x8xbf16>
    %19 = vector.shape_cast %18 : vector<1x1x8x8xbf16> to vector<8x8xbf16>
    %c8_31 = arith.constant 8 : index
    %c0_32 = arith.constant 0 : index
    %20 = vector.load %arg5[%c8_31, %c0_32] : memref<64x36xbf16, #tpu.memory_space<vmem>>, vector<8x8xbf16>
    tpu.vector_store %arg5[%c8_31, %c0_32], %19 {strides = array<i32>} : memref<64x36xbf16, #tpu.memory_space<vmem>>, vector<8x8xbf16>,
    %c0_33 = arith.constant 0 : index
    %c1_34 = arith.constant 1 : index
    %c1_35 = arith.constant 1 : index
    %c0_36 = arith.constant 0 : index
    %21 = vector.load %arg1[%c0_33, %c1_34, %c1_35, %c0_36] : memref<1x9x18x8xbf16, #tpu.memory_space<vmem>>, vector<1x1x8x4xbf16>
    %22 = vector.shape_cast %21 : vector<1x1x8x4xbf16> to vector<8x4xbf16>
    %c8_37 = arith.constant 8 : index
    %c8_38 = arith.constant 8 : index
    %23 = vector.load %arg5[%c8_37, %c8_38] : memref<64x36xbf16, #tpu.memory_space<vmem>>, vector<8x4xbf16>
    tpu.vector_store %arg5[%c8_37, %c8_38], %22 {strides = array<i32>} : memref<64x36xbf16, #tpu.memory_space<vmem>>, vector<8x4xbf16>,
    %c0_39 = arith.constant 0 : index
    %c1_40 = arith.constant 1 : index
    %c9_41 = arith.constant 9 : index
    %c0_42 = arith.constant 0 : index
    %24 = vector.load %arg1[%c0_39, %c1_40, %c9_41, %c0_42] : memref<1x9x18x8xbf16, #tpu.memory_space<vmem>>, vector<1x1x8x8xbf16>
    %25 = vector.shape_cast %24 : vector<1x1x8x8xbf16> to vector<8x8xbf16>
    %c8_43 = arith.constant 8 : index
    %c12_44 = arith.constant 12 : index
    %26 = vector.load %arg5[%c8_43, %c12_44] : memref<64x36xbf16, #tpu.memory_space<vmem>>, vector<8x8xbf16>
    tpu.vector_store %arg5[%c8_43, %c12_44], %25 {strides = array<i32>} : memref<64x36xbf16, #tpu.memory_space<vmem>>, vector<8x8xbf16>,
    %c0_45 = arith.constant 0 : index
    %c1_46 = arith.constant 1 : index
    %c10_47 = arith.constant 10 : index
    %c0_48 = arith.constant 0 : index
    %27 = vector.load %arg1[%c0_45, %c1_46, %c10_47, %c0_48] : memref<1x9x18x8xbf16, #tpu.memory_space<vmem>>, vector<1x1x8x4xbf16>
    %28 = vector.shape_cast %27 : vector<1x1x8x4xbf16> to vector<8x4xbf16>
    %c8_49 = arith.constant 8 : index
    %c20_50 = arith.constant 20 : index
    %29 = vector.load %arg5[%c8_49, %c20_50] : memref<64x36xbf16, #tpu.memory_space<vmem>>, vector<8x4xbf16>
    tpu.vector_store %arg5[%c8_49, %c20_50], %28 {strides = array<i32>} : memref<64x36xbf16, #tpu.memory_space<vmem>>, vector<8x4xbf16>,
    %c0_51 = arith.constant 0 : index
    %c2 = arith.constant 2 : index
    %c0_52 = arith.constant 0 : index
    %c0_53 = arith.constant 0 : index
    %30 = vector.load %arg1[%c0_51, %c2, %c0_52, %c0_53] : memref<1x9x18x8xbf16, #tpu.memory_space<vmem>>, vector<1x1x8x8xbf16>
    %31 = vector.shape_cast %30 : vector<1x1x8x8xbf16> to vector<8x8xbf16>
    %c8_54 = arith.constant 8 : index
    %c24_55 = arith.constant 24 : index
    %32 = vector.load %arg5[%c8_54, %c24_55] : memref<64x36xbf16, #tpu.memory_space<vmem>>, vector<8x8xbf16>
    tpu.vector_store %arg5[%c8_54, %c24_55], %31 {strides = array<i32>} : memref<64x36xbf16, #tpu.memory_space<vmem>>, vector<8x8xbf16>,
    %c0_56 = arith.constant 0 : index
    %c2_57 = arith.constant 2 : index
    %c1_58 = arith.constant 1 : index
    %c0_59 = arith.constant 0 : index
    %33 = vector.load %arg1[%c0_56, %c2_57, %c1_58, %c0_59] : memref<1x9x18x8xbf16, #tpu.memory_space<vmem>>, vector<1x1x8x4xbf16>
    %34 = vector.shape_cast %33 : vector<1x1x8x4xbf16> to vector<8x4xbf16>
    %c8_60 = arith.constant 8 : index
    %c32_61 = arith.constant 32 : index
    %35 = vector.load %arg5[%c8_60, %c32_61] : memref<64x36xbf16, #tpu.memory_space<vmem>>, vector<8x4xbf16>
    tpu.vector_store %arg5[%c8_60, %c32_61], %34 {strides = array<i32>} : memref<64x36xbf16, #tpu.memory_space<vmem>>, vector<8x4xbf16>,
    %c0_62 = arith.constant 0 : index
    %c2_63 = arith.constant 2 : index
    %c0_64 = arith.constant 0 : index
    %c0_65 = arith.constant 0 : index
    %36 = vector.load %arg1[%c0_62, %c2_63, %c0_64, %c0_65] : memref<1x9x18x8xbf16, #tpu.memory_space<vmem>>, vector<1x1x8x8xbf16>
    %37 = vector.shape_cast %36 : vector<1x1x8x8xbf16> to vector<8x8xbf16>
    %c16 = arith.constant 16 : index
    %c0_66 = arith.constant 0 : index
    %38 = vector.load %arg5[%c16, %c0_66] : memref<64x36xbf16, #tpu.memory_space<vmem>>, vector<8x8xbf16>
    tpu.vector_store %arg5[%c16, %c0_66], %37 {strides = array<i32>} : memref<64x36xbf16, #tpu.memory_space<vmem>>, vector<8x8xbf16>,
    %c0_67 = arith.constant 0 : index
    %c2_68 = arith.constant 2 : index
    %c1_69 = arith.constant 1 : index
    %c0_70 = arith.constant 0 : index
    %39 = vector.load %arg1[%c0_67, %c2_68, %c1_69, %c0_70] : memref<1x9x18x8xbf16, #tpu.memory_space<vmem>>, vector<1x1x8x4xbf16>
    %40 = vector.shape_cast %39 : vector<1x1x8x4xbf16> to vector<8x4xbf16>
    %c16_71 = arith.constant 16 : index
    %c8_72 = arith.constant 8 : index
    %41 = vector.load %arg5[%c16_71, %c8_72] : memref<64x36xbf16, #tpu.memory_space<vmem>>, vector<8x4xbf16>
    tpu.vector_store %arg5[%c16_71, %c8_72], %40 {strides = array<i32>} : memref<64x36xbf16, #tpu.memory_space<vmem>>, vector<8x4xbf16>,
    %c0_73 = arith.constant 0 : index
    %c2_74 = arith.constant 2 : index
    %c9_75 = arith.constant 9 : index
    %c0_76 = arith.constant 0 : index
    %42 = vector.load %arg1[%c0_73, %c2_74, %c9_75, %c0_76] : memref<1x9x18x8xbf16, #tpu.memory_space<vmem>>, vector<1x1x8x8xbf16>
    %43 = vector.shape_cast %42 : vector<1x1x8x8xbf16> to vector<8x8xbf16>
    %c16_77 = arith.constant 16 : index
    %c12_78 = arith.constant 12 : index
    %44 = vector.load %arg5[%c16_77, %c12_78] : memref<64x36xbf16, #tpu.memory_space<vmem>>, vector<8x8xbf16>
    tpu.vector_store %arg5[%c16_77, %c12_78], %43 {strides = array<i32>} : memref<64x36xbf16, #tpu.memory_space<vmem>>, vector<8x8xbf16>,
    %c0_79 = arith.constant 0 : index
    %c2_80 = arith.constant 2 : index
    %c10_81 = arith.constant 10 : index
    %c0_82 = arith.constant 0 : index
    %45 = vector.load %arg1[%c0_79, %c2_80, %c10_81, %c0_82] : memref<1x9x18x8xbf16, #tpu.memory_space<vmem>>, vector<1x1x8x4xbf16>
    %46 = vector.shape_cast %45 : vector<1x1x8x4xbf16> to vector<8x4xbf16>
    %c16_83 = arith.constant 16 : index
    %c20_84 = arith.constant 20 : index
    %47 = vector.load %arg5[%c16_83, %c20_84] : memref<64x36xbf16, #tpu.memory_space<vmem>>, vector<8x4xbf16>
    tpu.vector_store %arg5[%c16_83, %c20_84], %46 {strides = array<i32>} : memref<64x36xbf16, #tpu.memory_space<vmem>>, vector<8x4xbf16>,
    %c0_85 = arith.constant 0 : index
    %c3 = arith.constant 3 : index
    %c0_86 = arith.constant 0 : index
    %c0_87 = arith.constant 0 : index
    %48 = vector.load %arg1[%c0_85, %c3, %c0_86, %c0_87] : memref<1x9x18x8xbf16, #tpu.memory_space<vmem>>, vector<1x1x8x8xbf16>
    %49 = vector.shape_cast %48 : vector<1x1x8x8xbf16> to vector<8x8xbf16>
    %c16_88 = arith.constant 16 : index
    %c24_89 = arith.constant 24 : index
    %50 = vector.load %arg5[%c16_88, %c24_89] : memref<64x36xbf16, #tpu.memory_space<vmem>>, vector<8x8xbf16>
    tpu.vector_store %arg5[%c16_88, %c24_89], %49 {strides = array<i32>} : memref<64x36xbf16, #tpu.memory_space<vmem>>, vector<8x8xbf16>,
    %c0_90 = arith.constant 0 : index
    %c3_91 = arith.constant 3 : index
    %c1_92 = arith.constant 1 : index
    %c0_93 = arith.constant 0 : index
    %51 = vector.load %arg1[%c0_90, %c3_91, %c1_92, %c0_93] : memref<1x9x18x8xbf16, #tpu.memory_space<vmem>>, vector<1x1x8x4xbf16>
    %52 = vector.shape_cast %51 : vector<1x1x8x4xbf16> to vector<8x4xbf16>
    %c16_94 = arith.constant 16 : index
    %c32_95 = arith.constant 32 : index
    %53 = vector.load %arg5[%c16_94, %c32_95] : memref<64x36xbf16, #tpu.memory_space<vmem>>, vector<8x4xbf16>
    tpu.vector_store %arg5[%c16_94, %c32_95], %52 {strides = array<i32>} : memref<64x36xbf16, #tpu.memory_space<vmem>>, vector<8x4xbf16>,
    %c0_96 = arith.constant 0 : index
    %c3_97 = arith.constant 3 : index
    %c0_98 = arith.constant 0 : index
    %c0_99 = arith.constant 0 : index
    %54 = vector.load %arg1[%c0_96, %c3_97, %c0_98, %c0_99] : memref<1x9x18x8xbf16, #tpu.memory_space<vmem>>, vector<1x1x8x8xbf16>
    %55 = vector.shape_cast %54 : vector<1x1x8x8xbf16> to vector<8x8xbf16>
    %c24_100 = arith.constant 24 : index
    %c0_101 = arith.constant 0 : index
    %56 = vector.load %arg5[%c24_100, %c0_101] : memref<64x36xbf16, #tpu.memory_space<vmem>>, vector<8x8xbf16>
    tpu.vector_store %arg5[%c24_100, %c0_101], %55 {strides = array<i32>} : memref<64x36xbf16, #tpu.memory_space<vmem>>, vector<8x8xbf16>,
    %c0_102 = arith.constant 0 : index
    %c3_103 = arith.constant 3 : index
    %c1_104 = arith.constant 1 : index
    %c0_105 = arith.constant 0 : index
    %57 = vector.load %arg1[%c0_102, %c3_103, %c1_104, %c0_105] : memref<1x9x18x8xbf16, #tpu.memory_space<vmem>>, vector<1x1x8x4xbf16>
    %58 = vector.shape_cast %57 : vector<1x1x8x4xbf16> to vector<8x4xbf16>
    %c24_106 = arith.constant 24 : index
    %c8_107 = arith.constant 8 : index
    %59 = vector.load %arg5[%c24_106, %c8_107] : memref<64x36xbf16, #tpu.memory_space<vmem>>, vector<8x4xbf16>
    tpu.vector_store %arg5[%c24_106, %c8_107], %58 {strides = array<i32>} : memref<64x36xbf16, #tpu.memory_space<vmem>>, vector<8x4xbf16>,
    %c0_108 = arith.constant 0 : index
    %c3_109 = arith.constant 3 : index
    %c9_110 = arith.constant 9 : index
    %c0_111 = arith.constant 0 : index
    %60 = vector.load %arg1[%c0_108, %c3_109, %c9_110, %c0_111] : memref<1x9x18x8xbf16, #tpu.memory_space<vmem>>, vector<1x1x8x8xbf16>
    %61 = vector.shape_cast %60 : vector<1x1x8x8xbf16> to vector<8x8xbf16>
    %c24_112 = arith.constant 24 : index
    %c12_113 = arith.constant 12 : index
    %62 = vector.load %arg5[%c24_112, %c12_113] : memref<64x36xbf16, #tpu.memory_space<vmem>>, vector<8x8xbf16>
    tpu.vector_store %arg5[%c24_112, %c12_113], %61 {strides = array<i32>} : memref<64x36xbf16, #tpu.memory_space<vmem>>, vector<8x8xbf16>,
    %c0_114 = arith.constant 0 : index
    %c3_115 = arith.constant 3 : index
    %c10_116 = arith.constant 10 : index
    %c0_117 = arith.constant 0 : index
    %63 = vector.load %arg1[%c0_114, %c3_115, %c10_116, %c0_117] : memref<1x9x18x8xbf16, #tpu.memory_space<vmem>>, vector<1x1x8x4xbf16>
    %64 = vector.shape_cast %63 : vector<1x1x8x4xbf16> to vector<8x4xbf16>
    %c24_118 = arith.constant 24 : index
    %c20_119 = arith.constant 20 : index
    %65 = vector.load %arg5[%c24_118, %c20_119] : memref<64x36xbf16, #tpu.memory_space<vmem>>, vector<8x4xbf16>
    tpu.vector_store %arg5[%c24_118, %c20_119], %64 {strides = array<i32>} : memref<64x36xbf16, #tpu.memory_space<vmem>>, vector<8x4xbf16>,
    %c0_120 = arith.constant 0 : index
    %c4 = arith.constant 4 : index
    %c0_121 = arith.constant 0 : index
    %c0_122 = arith.constant 0 : index
    %66 = vector.load %arg1[%c0_120, %c4, %c0_121, %c0_122] : memref<1x9x18x8xbf16, #tpu.memory_space<vmem>>, vector<1x1x8x8xbf16>
    %67 = vector.shape_cast %66 : vector<1x1x8x8xbf16> to vector<8x8xbf16>
    %c24_123 = arith.constant 24 : index
    %c24_124 = arith.constant 24 : index
    %68 = vector.load %arg5[%c24_123, %c24_124] : memref<64x36xbf16, #tpu.memory_space<vmem>>, vector<8x8xbf16>
    tpu.vector_store %arg5[%c24_123, %c24_124], %67 {strides = array<i32>} : memref<64x36xbf16, #tpu.memory_space<vmem>>, vector<8x8xbf16>,
    %c0_125 = arith.constant 0 : index
    %c4_126 = arith.constant 4 : index
    %c1_127 = arith.constant 1 : index
    %c0_128 = arith.constant 0 : index
    %69 = vector.load %arg1[%c0_125, %c4_126, %c1_127, %c0_128] : memref<1x9x18x8xbf16, #tpu.memory_space<vmem>>, vector<1x1x8x4xbf16>
    %70 = vector.shape_cast %69 : vector<1x1x8x4xbf16> to vector<8x4xbf16>
    %c24_129 = arith.constant 24 : index
    %c32_130 = arith.constant 32 : index
    %71 = vector.load %arg5[%c24_129, %c32_130] : memref<64x36xbf16, #tpu.memory_space<vmem>>, vector<8x4xbf16>
    tpu.vector_store %arg5[%c24_129, %c32_130], %70 {strides = array<i32>} : memref<64x36xbf16, #tpu.memory_space<vmem>>, vector<8x4xbf16>,
    %c0_131 = arith.constant 0 : index
    %c4_132 = arith.constant 4 : index
    %c0_133 = arith.constant 0 : index
    %c0_134 = arith.constant 0 : index
    %72 = vector.load %arg1[%c0_131, %c4_132, %c0_133, %c0_134] : memref<1x9x18x8xbf16, #tpu.memory_space<vmem>>, vector<1x1x8x8xbf16>
    %73 = vector.shape_cast %72 : vector<1x1x8x8xbf16> to vector<8x8xbf16>
    %c32_135 = arith.constant 32 : index
    %c0_136 = arith.constant 0 : index
    %74 = vector.load %arg5[%c32_135, %c0_136] : memref<64x36xbf16, #tpu.memory_space<vmem>>, vector<8x8xbf16>
    tpu.vector_store %arg5[%c32_135, %c0_136], %73 {strides = array<i32>} : memref<64x36xbf16, #tpu.memory_space<vmem>>, vector<8x8xbf16>,
    %c0_137 = arith.constant 0 : index
    %c4_138 = arith.constant 4 : index
    %c1_139 = arith.constant 1 : index
    %c0_140 = arith.constant 0 : index
    %75 = vector.load %arg1[%c0_137, %c4_138, %c1_139, %c0_140] : memref<1x9x18x8xbf16, #tpu.memory_space<vmem>>, vector<1x1x8x4xbf16>
    %76 = vector.shape_cast %75 : vector<1x1x8x4xbf16> to vector<8x4xbf16>
    %c32_141 = arith.constant 32 : index
    %c8_142 = arith.constant 8 : index
    %77 = vector.load %arg5[%c32_141, %c8_142] : memref<64x36xbf16, #tpu.memory_space<vmem>>, vector<8x4xbf16>
    tpu.vector_store %arg5[%c32_141, %c8_142], %76 {strides = array<i32>} : memref<64x36xbf16, #tpu.memory_space<vmem>>, vector<8x4xbf16>,
    %c0_143 = arith.constant 0 : index
    %c4_144 = arith.constant 4 : index
    %c9_145 = arith.constant 9 : index
    %c0_146 = arith.constant 0 : index
    %78 = vector.load %arg1[%c0_143, %c4_144, %c9_145, %c0_146] : memref<1x9x18x8xbf16, #tpu.memory_space<vmem>>, vector<1x1x8x8xbf16>
    %79 = vector.shape_cast %78 : vector<1x1x8x8xbf16> to vector<8x8xbf16>
    %c32_147 = arith.constant 32 : index
    %c12_148 = arith.constant 12 : index
    %80 = vector.load %arg5[%c32_147, %c12_148] : memref<64x36xbf16, #tpu.memory_space<vmem>>, vector<8x8xbf16>
    tpu.vector_store %arg5[%c32_147, %c12_148], %79 {strides = array<i32>} : memref<64x36xbf16, #tpu.memory_space<vmem>>, vector<8x8xbf16>,
    %c0_149 = arith.constant 0 : index
    %c4_150 = arith.constant 4 : index
    %c10_151 = arith.constant 10 : index
    %c0_152 = arith.constant 0 : index
    %81 = vector.load %arg1[%c0_149, %c4_150, %c10_151, %c0_152] : memref<1x9x18x8xbf16, #tpu.memory_space<vmem>>, vector<1x1x8x4xbf16>
    %82 = vector.shape_cast %81 : vector<1x1x8x4xbf16> to vector<8x4xbf16>
    %c32_153 = arith.constant 32 : index
    %c20_154 = arith.constant 20 : index
    %83 = vector.load %arg5[%c32_153, %c20_154] : memref<64x36xbf16, #tpu.memory_space<vmem>>, vector<8x4xbf16>
    tpu.vector_store %arg5[%c32_153, %c20_154], %82 {strides = array<i32>} : memref<64x36xbf16, #tpu.memory_space<vmem>>, vector<8x4xbf16>,
    %c0_155 = arith.constant 0 : index
    %c5 = arith.constant 5 : index
    %c0_156 = arith.constant 0 : index
    %c0_157 = arith.constant 0 : index
    %84 = vector.load %arg1[%c0_155, %c5, %c0_156, %c0_157] : memref<1x9x18x8xbf16, #tpu.memory_space<vmem>>, vector<1x1x8x8xbf16>
    %85 = vector.shape_cast %84 : vector<1x1x8x8xbf16> to vector<8x8xbf16>
    %c32_158 = arith.constant 32 : index
    %c24_159 = arith.constant 24 : index
    %86 = vector.load %arg5[%c32_158, %c24_159] : memref<64x36xbf16, #tpu.memory_space<vmem>>, vector<8x8xbf16>
    tpu.vector_store %arg5[%c32_158, %c24_159], %85 {strides = array<i32>} : memref<64x36xbf16, #tpu.memory_space<vmem>>, vector<8x8xbf16>,
    %c0_160 = arith.constant 0 : index
    %c5_161 = arith.constant 5 : index
    %c1_162 = arith.constant 1 : index
    %c0_163 = arith.constant 0 : index
    %87 = vector.load %arg1[%c0_160, %c5_161, %c1_162, %c0_163] : memref<1x9x18x8xbf16, #tpu.memory_space<vmem>>, vector<1x1x8x4xbf16>
    %88 = vector.shape_cast %87 : vector<1x1x8x4xbf16> to vector<8x4xbf16>
    %c32_164 = arith.constant 32 : index
    %c32_165 = arith.constant 32 : index
    %89 = vector.load %arg5[%c32_164, %c32_165] : memref<64x36xbf16, #tpu.memory_space<vmem>>, vector<8x4xbf16>
    tpu.vector_store %arg5[%c32_164, %c32_165], %88 {strides = array<i32>} : memref<64x36xbf16, #tpu.memory_space<vmem>>, vector<8x4xbf16>,
    %c0_166 = arith.constant 0 : index
    %c5_167 = arith.constant 5 : index
    %c0_168 = arith.constant 0 : index
    %c0_169 = arith.constant 0 : index
    %90 = vector.load %arg1[%c0_166, %c5_167, %c0_168, %c0_169] : memref<1x9x18x8xbf16, #tpu.memory_space<vmem>>, vector<1x1x8x8xbf16>
    %91 = vector.shape_cast %90 : vector<1x1x8x8xbf16> to vector<8x8xbf16>
    %c40 = arith.constant 40 : index
    %c0_170 = arith.constant 0 : index
    %92 = vector.load %arg5[%c40, %c0_170] : memref<64x36xbf16, #tpu.memory_space<vmem>>, vector<8x8xbf16>
    tpu.vector_store %arg5[%c40, %c0_170], %91 {strides = array<i32>} : memref<64x36xbf16, #tpu.memory_space<vmem>>, vector<8x8xbf16>,
    %c0_171 = arith.constant 0 : index
    %c5_172 = arith.constant 5 : index
    %c1_173 = arith.constant 1 : index
    %c0_174 = arith.constant 0 : index
    %93 = vector.load %arg1[%c0_171, %c5_172, %c1_173, %c0_174] : memref<1x9x18x8xbf16, #tpu.memory_space<vmem>>, vector<1x1x8x4xbf16>
    %94 = vector.shape_cast %93 : vector<1x1x8x4xbf16> to vector<8x4xbf16>
    %c40_175 = arith.constant 40 : index
    %c8_176 = arith.constant 8 : index
    %95 = vector.load %arg5[%c40_175, %c8_176] : memref<64x36xbf16, #tpu.memory_space<vmem>>, vector<8x4xbf16>
    tpu.vector_store %arg5[%c40_175, %c8_176], %94 {strides = array<i32>} : memref<64x36xbf16, #tpu.memory_space<vmem>>, vector<8x4xbf16>,
    %c0_177 = arith.constant 0 : index
    %c5_178 = arith.constant 5 : index
    %c9_179 = arith.constant 9 : index
    %c0_180 = arith.constant 0 : index
    %96 = vector.load %arg1[%c0_177, %c5_178, %c9_179, %c0_180] : memref<1x9x18x8xbf16, #tpu.memory_space<vmem>>, vector<1x1x8x8xbf16>
    %97 = vector.shape_cast %96 : vector<1x1x8x8xbf16> to vector<8x8xbf16>
    %c40_181 = arith.constant 40 : index
    %c12_182 = arith.constant 12 : index
    %98 = vector.load %arg5[%c40_181, %c12_182] : memref<64x36xbf16, #tpu.memory_space<vmem>>, vector<8x8xbf16>
    tpu.vector_store %arg5[%c40_181, %c12_182], %97 {strides = array<i32>} : memref<64x36xbf16, #tpu.memory_space<vmem>>, vector<8x8xbf16>,
    %c0_183 = arith.constant 0 : index
    %c5_184 = arith.constant 5 : index
    %c10_185 = arith.constant 10 : index
    %c0_186 = arith.constant 0 : index
    %99 = vector.load %arg1[%c0_183, %c5_184, %c10_185, %c0_186] : memref<1x9x18x8xbf16, #tpu.memory_space<vmem>>, vector<1x1x8x4xbf16>
    %100 = vector.shape_cast %99 : vector<1x1x8x4xbf16> to vector<8x4xbf16>
    %c40_187 = arith.constant 40 : index
    %c20_188 = arith.constant 20 : index
    %101 = vector.load %arg5[%c40_187, %c20_188] : memref<64x36xbf16, #tpu.memory_space<vmem>>, vector<8x4xbf16>
    tpu.vector_store %arg5[%c40_187, %c20_188], %100 {strides = array<i32>} : memref<64x36xbf16, #tpu.memory_space<vmem>>, vector<8x4xbf16>,
    %c0_189 = arith.constant 0 : index
    %c6 = arith.constant 6 : index
    %c0_190 = arith.constant 0 : index
    %c0_191 = arith.constant 0 : index
    %102 = vector.load %arg1[%c0_189, %c6, %c0_190, %c0_191] : memref<1x9x18x8xbf16, #tpu.memory_space<vmem>>, vector<1x1x8x8xbf16>
    %103 = vector.shape_cast %102 : vector<1x1x8x8xbf16> to vector<8x8xbf16>
    %c40_192 = arith.constant 40 : index
    %c24_193 = arith.constant 24 : index
    %104 = vector.load %arg5[%c40_192, %c24_193] : memref<64x36xbf16, #tpu.memory_space<vmem>>, vector<8x8xbf16>
    tpu.vector_store %arg5[%c40_192, %c24_193], %103 {strides = array<i32>} : memref<64x36xbf16, #tpu.memory_space<vmem>>, vector<8x8xbf16>,
    %c0_194 = arith.constant 0 : index
    %c6_195 = arith.constant 6 : index
    %c1_196 = arith.constant 1 : index
    %c0_197 = arith.constant 0 : index
    %105 = vector.load %arg1[%c0_194, %c6_195, %c1_196, %c0_197] : memref<1x9x18x8xbf16, #tpu.memory_space<vmem>>, vector<1x1x8x4xbf16>
    %106 = vector.shape_cast %105 : vector<1x1x8x4xbf16> to vector<8x4xbf16>
    %c40_198 = arith.constant 40 : index
    %c32_199 = arith.constant 32 : index
    %107 = vector.load %arg5[%c40_198, %c32_199] : memref<64x36xbf16, #tpu.memory_space<vmem>>, vector<8x4xbf16>
    tpu.vector_store %arg5[%c40_198, %c32_199], %106 {strides = array<i32>} : memref<64x36xbf16, #tpu.memory_space<vmem>>, vector<8x4xbf16>,
    %c0_200 = arith.constant 0 : index
    %c6_201 = arith.constant 6 : index
    %c0_202 = arith.constant 0 : index
    %c0_203 = arith.constant 0 : index
    %108 = vector.load %arg1[%c0_200, %c6_201, %c0_202, %c0_203] : memref<1x9x18x8xbf16, #tpu.memory_space<vmem>>, vector<1x1x8x8xbf16>
    %109 = vector.shape_cast %108 : vector<1x1x8x8xbf16> to vector<8x8xbf16>
    %c48 = arith.constant 48 : index
    %c0_204 = arith.constant 0 : index
    %110 = vector.load %arg5[%c48, %c0_204] : memref<64x36xbf16, #tpu.memory_space<vmem>>, vector<8x8xbf16>
    tpu.vector_store %arg5[%c48, %c0_204], %109 {strides = array<i32>} : memref<64x36xbf16, #tpu.memory_space<vmem>>, vector<8x8xbf16>,
    %c0_205 = arith.constant 0 : index
    %c6_206 = arith.constant 6 : index
    %c1_207 = arith.constant 1 : index
    %c0_208 = arith.constant 0 : index
    %111 = vector.load %arg1[%c0_205, %c6_206, %c1_207, %c0_208] : memref<1x9x18x8xbf16, #tpu.memory_space<vmem>>, vector<1x1x8x4xbf16>
    %112 = vector.shape_cast %111 : vector<1x1x8x4xbf16> to vector<8x4xbf16>
    %c48_209 = arith.constant 48 : index
    %c8_210 = arith.constant 8 : index
    %113 = vector.load %arg5[%c48_209, %c8_210] : memref<64x36xbf16, #tpu.memory_space<vmem>>, vector<8x4xbf16>
    tpu.vector_store %arg5[%c48_209, %c8_210], %112 {strides = array<i32>} : memref<64x36xbf16, #tpu.memory_space<vmem>>, vector<8x4xbf16>,
    %c0_211 = arith.constant 0 : index
    %c6_212 = arith.constant 6 : index
    %c9_213 = arith.constant 9 : index
    %c0_214 = arith.constant 0 : index
    %114 = vector.load %arg1[%c0_211, %c6_212, %c9_213, %c0_214] : memref<1x9x18x8xbf16, #tpu.memory_space<vmem>>, vector<1x1x8x8xbf16>
    %115 = vector.shape_cast %114 : vector<1x1x8x8xbf16> to vector<8x8xbf16>
    %c48_215 = arith.constant 48 : index
    %c12_216 = arith.constant 12 : index
    %116 = vector.load %arg5[%c48_215, %c12_216] : memref<64x36xbf16, #tpu.memory_space<vmem>>, vector<8x8xbf16>
    tpu.vector_store %arg5[%c48_215, %c12_216], %115 {strides = array<i32>} : memref<64x36xbf16, #tpu.memory_space<vmem>>, vector<8x8xbf16>,
    %c0_217 = arith.constant 0 : index
    %c6_218 = arith.constant 6 : index
    %c10_219 = arith.constant 10 : index
    %c0_220 = arith.constant 0 : index
    %117 = vector.load %arg1[%c0_217, %c6_218, %c10_219, %c0_220] : memref<1x9x18x8xbf16, #tpu.memory_space<vmem>>, vector<1x1x8x4xbf16>
    %118 = vector.shape_cast %117 : vector<1x1x8x4xbf16> to vector<8x4xbf16>
    %c48_221 = arith.constant 48 : index
    %c20_222 = arith.constant 20 : index
    %119 = vector.load %arg5[%c48_221, %c20_222] : memref<64x36xbf16, #tpu.memory_space<vmem>>, vector<8x4xbf16>
    tpu.vector_store %arg5[%c48_221, %c20_222], %118 {strides = array<i32>} : memref<64x36xbf16, #tpu.memory_space<vmem>>, vector<8x4xbf16>,
    %c0_223 = arith.constant 0 : index
    %c7 = arith.constant 7 : index
    %c0_224 = arith.constant 0 : index
    %c0_225 = arith.constant 0 : index
    %120 = vector.load %arg1[%c0_223, %c7, %c0_224, %c0_225] : memref<1x9x18x8xbf16, #tpu.memory_space<vmem>>, vector<1x1x8x8xbf16>
    %121 = vector.shape_cast %120 : vector<1x1x8x8xbf16> to vector<8x8xbf16>
    %c48_226 = arith.constant 48 : index
    %c24_227 = arith.constant 24 : index
    %122 = vector.load %arg5[%c48_226, %c24_227] : memref<64x36xbf16, #tpu.memory_space<vmem>>, vector<8x8xbf16>
    tpu.vector_store %arg5[%c48_226, %c24_227], %121 {strides = array<i32>} : memref<64x36xbf16, #tpu.memory_space<vmem>>, vector<8x8xbf16>,
    %c0_228 = arith.constant 0 : index
    %c7_229 = arith.constant 7 : index
    %c1_230 = arith.constant 1 : index
    %c0_231 = arith.constant 0 : index
    %123 = vector.load %arg1[%c0_228, %c7_229, %c1_230, %c0_231] : memref<1x9x18x8xbf16, #tpu.memory_space<vmem>>, vector<1x1x8x4xbf16>
    %124 = vector.shape_cast %123 : vector<1x1x8x4xbf16> to vector<8x4xbf16>
    %c48_232 = arith.constant 48 : index
    %c32_233 = arith.constant 32 : index
    %125 = vector.load %arg5[%c48_232, %c32_233] : memref<64x36xbf16, #tpu.memory_space<vmem>>, vector<8x4xbf16>
    tpu.vector_store %arg5[%c48_232, %c32_233], %124 {strides = array<i32>} : memref<64x36xbf16, #tpu.memory_space<vmem>>, vector<8x4xbf16>,
    %c0_234 = arith.constant 0 : index
    %c7_235 = arith.constant 7 : index
    %c0_236 = arith.constant 0 : index
    %c0_237 = arith.constant 0 : index
    %126 = vector.load %arg1[%c0_234, %c7_235, %c0_236, %c0_237] : memref<1x9x18x8xbf16, #tpu.memory_space<vmem>>, vector<1x1x8x8xbf16>
    %127 = vector.shape_cast %126 : vector<1x1x8x8xbf16> to vector<8x8xbf16>
    %c56 = arith.constant 56 : index
    %c0_238 = arith.constant 0 : index
    %128 = vector.load %arg5[%c56, %c0_238] : memref<64x36xbf16, #tpu.memory_space<vmem>>, vector<8x8xbf16>
    tpu.vector_store %arg5[%c56, %c0_238], %127 {strides = array<i32>} : memref<64x36xbf16, #tpu.memory_space<vmem>>, vector<8x8xbf16>,
    %c0_239 = arith.constant 0 : index
    %c7_240 = arith.constant 7 : index
    %c1_241 = arith.constant 1 : index
    %c0_242 = arith.constant 0 : index
    %129 = vector.load %arg1[%c0_239, %c7_240, %c1_241, %c0_242] : memref<1x9x18x8xbf16, #tpu.memory_space<vmem>>, vector<1x1x8x4xbf16>
    %130 = vector.shape_cast %129 : vector<1x1x8x4xbf16> to vector<8x4xbf16>
    %c56_243 = arith.constant 56 : index
    %c8_244 = arith.constant 8 : index
    %131 = vector.load %arg5[%c56_243, %c8_244] : memref<64x36xbf16, #tpu.memory_space<vmem>>, vector<8x4xbf16>
    tpu.vector_store %arg5[%c56_243, %c8_244], %130 {strides = array<i32>} : memref<64x36xbf16, #tpu.memory_space<vmem>>, vector<8x4xbf16>,
    %c0_245 = arith.constant 0 : index
    %c7_246 = arith.constant 7 : index
    %c9_247 = arith.constant 9 : index
    %c0_248 = arith.constant 0 : index
    %132 = vector.load %arg1[%c0_245, %c7_246, %c9_247, %c0_248] : memref<1x9x18x8xbf16, #tpu.memory_space<vmem>>, vector<1x1x8x8xbf16>
    %133 = vector.shape_cast %132 : vector<1x1x8x8xbf16> to vector<8x8xbf16>
    %c56_249 = arith.constant 56 : index
    %c12_250 = arith.constant 12 : index
    %134 = vector.load %arg5[%c56_249, %c12_250] : memref<64x36xbf16, #tpu.memory_space<vmem>>, vector<8x8xbf16>
    tpu.vector_store %arg5[%c56_249, %c12_250], %133 {strides = array<i32>} : memref<64x36xbf16, #tpu.memory_space<vmem>>, vector<8x8xbf16>,
    %c0_251 = arith.constant 0 : index
    %c7_252 = arith.constant 7 : index
    %c10_253 = arith.constant 10 : index
    %c0_254 = arith.constant 0 : index
    %135 = vector.load %arg1[%c0_251, %c7_252, %c10_253, %c0_254] : memref<1x9x18x8xbf16, #tpu.memory_space<vmem>>, vector<1x1x8x4xbf16>
    %136 = vector.shape_cast %135 : vector<1x1x8x4xbf16> to vector<8x4xbf16>
    %c56_255 = arith.constant 56 : index
    %c20_256 = arith.constant 20 : index
    %137 = vector.load %arg5[%c56_255, %c20_256] : memref<64x36xbf16, #tpu.memory_space<vmem>>, vector<8x4xbf16>
    tpu.vector_store %arg5[%c56_255, %c20_256], %136 {strides = array<i32>} : memref<64x36xbf16, #tpu.memory_space<vmem>>, vector<8x4xbf16>,
    %c0_257 = arith.constant 0 : index
    %c8_258 = arith.constant 8 : index
    %c0_259 = arith.constant 0 : index
    %c0_260 = arith.constant 0 : index
    %138 = vector.load %arg1[%c0_257, %c8_258, %c0_259, %c0_260] : memref<1x9x18x8xbf16, #tpu.memory_space<vmem>>, vector<1x1x8x8xbf16>
    %139 = vector.shape_cast %138 : vector<1x1x8x8xbf16> to vector<8x8xbf16>
    %c56_261 = arith.constant 56 : index
    %c24_262 = arith.constant 24 : index
    %140 = vector.load %arg5[%c56_261, %c24_262] : memref<64x36xbf16, #tpu.memory_space<vmem>>, vector<8x8xbf16>
    tpu.vector_store %arg5[%c56_261, %c24_262], %139 {strides = array<i32>} : memref<64x36xbf16, #tpu.memory_space<vmem>>, vector<8x8xbf16>,
    %c0_263 = arith.constant 0 : index
    %c8_264 = arith.constant 8 : index
    %c1_265 = arith.constant 1 : index
    %c0_266 = arith.constant 0 : index
    %141 = vector.load %arg1[%c0_263, %c8_264, %c1_265, %c0_266] : memref<1x9x18x8xbf16, #tpu.memory_space<vmem>>, vector<1x1x8x4xbf16>
    %142 = vector.shape_cast %141 : vector<1x1x8x4xbf16> to vector<8x4xbf16>
    %c56_267 = arith.constant 56 : index
    %c32_268 = arith.constant 32 : index
    %143 = vector.load %arg5[%c56_267, %c32_268] : memref<64x36xbf16, #tpu.memory_space<vmem>>, vector<8x4xbf16>
    tpu.vector_store %arg5[%c56_267, %c32_268], %142 {strides = array<i32>} : memref<64x36xbf16, #tpu.memory_space<vmem>>, vector<8x4xbf16>,
    %c0_269 = arith.constant 0 : index
    %c0_270 = arith.constant 0 : index
    %144 = vector.load %arg5[%c0_269, %c0_270] : memref<64x36xbf16, #tpu.memory_space<vmem>>, vector<64x36xbf16>
    %c0_271 = arith.constant 0 : index
    %c0_272 = arith.constant 0 : index
    %145 = vector.load %arg2[%c0_271, %c0_272] : memref<36x4xbf16, #tpu.memory_space<vmem>>, vector<36x4xbf16>
    %cst = arith.constant dense<0.000000e+00> : vector<64x4xf32>
    %146 = tpu.matmul %144, %145, %cst {dimension_numbers = #tpu.dot_dimension_numbers<[1], [0], [0], [1], [0, 0, 1, 1], [], []>} : vector<64x36xbf16>, vector<36x4xbf16>, vector<64x4xf32> -> vector<64x4xf32>
    %c0_273 = arith.constant 0 : index
    %c0_274 = arith.constant 0 : index
    %147 = vector.load %arg3[%c0_273, %c0_274] : memref<1x4xf32, #tpu.memory_space<vmem>>, vector<1x4xf32>
    %148 = vector.broadcast %147 : vector<1x4xf32> to vector<64x4xf32>
    %149 = arith.addf %146, %148 : vector<64x4xf32>
    %cst_275 = arith.constant 0.000000e+00 : f32
    %150 = vector.broadcast %cst_275 : f32 to vector<64x4xf32>
    %151 = arith.maximumf %149, %150 : vector<64x4xf32>
    %c0_276 = arith.constant 0 : index
    %c0_277 = arith.constant 0 : index
    %c0_278 = arith.constant 0 : index
    %152 = vector.load %arg4[%c0_276, %c0_277, %c0_278] : memref<1x64x4xf32, #tpu.memory_space<vmem>>, vector<1x64x4xf32>
    %153 = vector.shape_cast %152 : vector<1x64x4xf32> to vector<64x4xf32>
    %154 = vector.shape_cast %151 : vector<64x4xf32> to vector<1x64x4xf32>
    tpu.vector_store %arg4[%c0_276, %c0_277, %c0_278], %154 {strides = array<i32>} : memref<1x64x4xf32, #tpu.memory_space<vmem>>, vector<1x64x4xf32>,
    return
  }
  func.func @transform_0(%arg0: i32) -> (i32, i32, i32, i32) {
    %c0_i32 = arith.constant 0 : i32
    %c0_i32_0 = arith.constant 0 : i32
    %c0_i32_1 = arith.constant 0 : i32
    %c0_i32_2 = arith.constant 0 : i32
    return %arg0, %c0_i32, %c0_i32_0, %c0_i32_1 : i32, i32, i32, i32
  }
  func.func @transform_1(%arg0: i32) -> (i32, i32) {
    %c0_i32 = arith.constant 0 : i32
    %c0_i32_0 = arith.constant 0 : i32
    %c0_i32_1 = arith.constant 0 : i32
    return %c0_i32, %c0_i32_0 : i32, i32
  }
  func.func @transform_2(%arg0: i32) -> (i32, i32) {
    %c0_i32 = arith.constant 0 : i32
    %c0_i32_0 = arith.constant 0 : i32
    %c0_i32_1 = arith.constant 0 : i32
    return %c0_i32, %c0_i32_0 : i32, i32
  }
  func.func @transform_3(%arg0: i32) -> (i32, i32, i32) {
    %c0_i32 = arith.constant 0 : i32
    %c0_i32_0 = arith.constant 0 : i32
    %c0_i32_1 = arith.constant 0 : i32
    return %arg0, %c0_i32, %c0_i32_0 : i32, i32, i32
  }
}

</mosaic_0001>

<bundles_post_ra>
// kernel: tpu_custom_call.1
= control target key start
LH: loop header
LB: loop body
LE: loop exit
PB: predicated region body
PF: predicated region fallthrough
CT: control target
= control target key end

     0   :  { %s1228_s12 = smov 0   ;;  %s1596_s0 = inlined_call_operand.vmem [shape: bf16[2,9,18,8], index: 0, kind: input, shape index: {}]   ;;  %s1597_s1 = inlined_call_operand.vmem [shape: bf16[36,4], index: 1, kind: input, shape index: {}]   ;;  %s1598_s2 = inlined_call_operand.vmem [shape: f32[1,4], index: 2, kind: input, shape index: {}]   ;;  %s1599_s3 = inlined_call_operand.vmem [shape: f32[2,64,4], index: 3, kind: output, shape index: {}]  }
   0x1 LB: > { %s1041_s13 = sadd.s32 4294967295, %s1201_s12   ;;  %p1045_p0 = scmp.ge.s32.totalorder %s1201_s12, 1  ;;  %s1201_s12 = sphi %s1228_s12, %s13_s12  }
   0x2   : > { %p137_p1 = scmp.lt.s32.totalorder %s1201_s12, 3 }
   0x4   : > { %p138_p2 = pnand %p1045_p0, %p137_p1 }
   0x5   : > { %p161_p3 = scmp.lt.s32.totalorder (!%p138_p2), %s1041_s13, 1  ;;  %s1203_s18 = smov (!%p138_p2), 8  }
   0x6   : > { %141 = sbr.rel (%p138_p2) target bundleno = 431 (0x1af), region = 32  ;;  %s1204_s19 = smov (!%p138_p2), 12  }
   0x7   : > { %s1205_s20 = smov (!%p138_p2), 20   ;;  %s1206_s21 = smov (!%p138_p2), 24  }
   0x8   : > { %s1207_s22 = smov (!%p138_p2), 32  }
   0xb   : > { %s1605_s13 = smov (!%p161_p3, %s1041_s13), 1  ;;  %vm177_vm0 = vsmask.f32 3328  ;;  %vm178_vm1 = vsmask.f32 7440  ;;  %vm224_vm3 = vcmask 1042432  }
   0xc   : > { %s1174_s14 = smul.u32 108, %s1605_s13  ;;  %vm1255_vm2 = vmor %vm177_vm0, %vm178_vm1  ;;  %vm225_vm4 = vcmask 1046532   ;;  %vm173_vm6 = vcmask 60416   ;;  %vm900_vm7 = vcmask 1041408   ;;  %vm197_vm8 = vcmask 93248   ;;  %s1144_s4 = sshll.u32 %s1605_s13, 6 }
   0xd   : > { %vm1314_vm5 = vmor %vm224_vm3, %vm225_vm4  ;;  %vm218_vm9 = vcmask 158816   ;;  %vm234_vm10 = vcmask 191648   ;;  %vm242_vm11 = vcmask 257216   ;;  %vm263_vm12 = vcmask 290048   ;;  %s1575_s7 = scalar_lea.vmem %s1599_s3, %s1144_s4 }
   0xe   : > { %s1242_s17 = scalar_lea.vmem %s1596_s0, %s1174_s14  ;;  %vm887_vm13 = vcmask 293888   ;;  %vm977_vm14 = vcmask 31744  }
   0xf   : > { %v1087_v0 = vld [vmem:[%s1242_s17 + $0x30] sm:$0xf]  ;;  %v1088_v1 = vld [vmem:[%s1242_s17 + $0x34] sm:$0x1]  ;;  %v175_v2 = vld [vmem:[%s1242_s17] sm:$0xf] }
  0x10   : > { %v513_v3 = vshrl.u32 %v1087_v0, 16  ;;  %v516_v4 = vshll.u32 %v1087_v0, 16  ;;  %v522_v5 = vshll.u32 %v1088_v1, 16  ;;  %v176_v6 = vld [vmem:[%s1242_s17 + $0x4] sm:$0x1]  ;;  %v181_v7 = vshrl.u32 %v175_v2, 16 }
  0x11   : > { %v184_v8 = vshll.u32 %v175_v2, 16  ;;  %v190_v9 = vshll.u32 %v176_v6, 16  ;;  %v1098_v10 = vld [vmem:[%s1242_s17 + $0x3c] sm:$0xf]  ;;  %v1099_v11 = vld [vmem:[%s1242_s17 + $0x40] sm:$0x1] }
  0x12   : > { %v515_v12 = vrot.slane %v513_v3, 4  ;;  %v518_v13 = vrot.slane %v516_v4, 5  ;;  %v524_v14 = vrot.slane %v522_v5, 5  ;;  %v183_v15 = vrot.slane %v181_v7, 4  ;;  %v1054_v16 = vld [vmem:[%s1242_s17 + $0xc] sm:$0xf] }
  0x13   : > { %v186_v17 = vrot.slane %v184_v8, 5  ;;  %v192_v18 = vrot.slane %v190_v9, 5  ;;  %v594_v19 = vshrl.u32 %v1098_v10, 16  ;;  %v597_v20 = vshll.u32 %v1098_v10, 16  ;;  %v1055_v21 = vld [vmem:[%s1242_s17 + $0x10] sm:$0x1] }
  0x14   : > { %v519_v22 = vor.u32 %v518_v13, %v515_v12  ;;  %v603_v23 = vshll.u32 %v1099_v11, 16  ;;  %v270_v24 = vshrl.u32 %v1054_v16, 16  ;;  %v273_v25 = vshll.u32 %v1054_v16, 16  ;;  %v1056_v26 = vld [vmem:[%s1242_s17 + $0x10] sm:$0xf] }
  0x15   : > { %v187_v28 = vor.u32 %v186_v17, %v183_v15  ;;  %v596_v29 = vrot.slane %v594_v19, 4  ;;  %v599_v30 = vrot.slane %v597_v20, 5  ;;  %v279_v31 = vshll.u32 %v1055_v21, 16  ;;  %v1057_v32 = vld [vmem:[%s1242_s17 + $0x14] sm:$0x1] }
  0x16   : > { %v520_v33 = vrot.slane %v519_v22, 4  ;;  %v605_v34 = vrot.slane %v603_v23, 5  ;;  %v272_v35 = vrot.slane %v270_v24, 4  ;;  %v275_v36 = vrot.slane %v273_v25, 5  ;;  %v199_v37 = vld [vmem:[%s1242_s17 + $0x4] sm:$0xf] }
  0x17   : > { %v188_v38 = vrot.slane %v187_v28, 4  ;;  %v600_v39 = vor.u32 %v599_v30, %v596_v29  ;;  %v281_v40 = vrot.slane %v279_v31, 5  ;;  %v290_v41 = vshrl.u32 %v1056_v26, 16  ;;  %v200_v46 = vld [vmem:[%s1242_s17 + $0x8] sm:$0x1] }
  0x18   : > { %v525_v42 = vsel %vm1255_vm2, %v520_v33, %v524_v14  ;;  %v276_v43 = vor.u32 %v275_v36, %v272_v35  ;;  %v293_v44 = vshll.u32 %v1056_v26, 16  ;;  %v299_v45 = vshll.u32 %v1057_v32, 16  ;;  %v1076_v47 = vld [vmem:[%s1242_s17 + $0x24] sm:$0xf]  ;;  %v1077_v52 = vld [vmem:[%s1242_s17 + $0x28] sm:$0x1] }
  0x19   : > { %526 = vrot.lane.b32.xlu1 %v525_v42, %s1203_s18  ;;  %v193_v48 = vsel %vm1255_vm2, %v188_v38, %v192_v18  ;;  %v601_v49 = vrot.slane %v600_v39, 4  ;;  %v292_v50 = vrot.slane %v290_v41, 4  ;;  %v202_v51 = vshrl.u32 %v199_v37, 16  ;;  %v1065_v57 = vld [vmem:[%s1242_s17 + $0x18] sm:$0xf] }
  0x1a   : > { %194 = vrot.lane.b32.xlu0 %v193_v48, %s1203_s18  ;;  %v277_v53 = vrot.slane %v276_v43, 4  ;;  %v295_v54 = vrot.slane %v293_v44, 5  ;;  %v301_v55 = vrot.slane %v299_v45, 5  ;;  %v205_v56 = vshll.u32 %v199_v37, 16  ;;  %v1066_v2 = vld [vmem:[%s1242_s17 + $0x1c] sm:$0x1] }
  0x1b   : > { %v606_v58 = vsel %vm1255_vm2, %v601_v49, %v605_v34  ;;  %v204_v59 = vrot.slane %v202_v51, 4  ;;  %v211_v60 = vshll.u32 %v200_v46, 16  ;;  %v432_v61 = vshrl.u32 %v1076_v47, 16  ;;  %v1100_v3 = vld [vmem:[%s1242_s17 + $0x40] sm:$0xf] }
  0x1c   : > { %v282_v62 = vsel %vm1255_vm2, %v277_v53, %v281_v40  ;;  %v296_v63 = vor.u32 %v295_v54, %v292_v50  ;;  %v207_v0 = vrot.slane %v205_v56, 5  ;;  %v435_v1 = vshll.u32 %v1076_v47, 16  ;;  %v1101_v12 = vld [vmem:[%s1242_s17 + $0x44] sm:$0x1]  ;;  %v1089_v17 = vld [vmem:[%s1242_s17 + $0x34] sm:$0xf] }
  0x1d   : > { %607 = vrot.lane.b32.xlu1 %v606_v58, %s1203_s18  ;;  %v213_v4 = vrot.slane %v211_v60, 5  ;;  %v434_v5 = vrot.slane %v432_v61, 4  ;;  %v441_v6 = vshll.u32 %v1077_v52, 16  ;;  %v351_v7 = vshrl.u32 %v1065_v57, 16  ;;  %v1090_v22 = vld [vmem:[%s1242_s17 + $0x38] sm:$0x1] }
  0x1e   : > { %283 = vrot.lane.b32.xlu0 %v282_v62, %s1203_s18  ;;  %v297_v8 = vrot.slane %v296_v63, 4  ;;  %v208_v9 = vor.u32 %v207_v0, %v204_v59  ;;  %v437_v10 = vrot.slane %v435_v1, 5  ;;  %v354_v11 = vshll.u32 %v1065_v57, 16  ;;  %v1120_v28 = vld [vmem:[%s1242_s17 + $0x54] sm:$0xf] }
  0x1f   : > { %v443_v13 = vrot.slane %v441_v6, 5  ;;  %v353_v14 = vrot.slane %v351_v7, 4  ;;  %v360_v15 = vshll.u32 %v1066_v2, 16  ;;  %v614_v16 = vshrl.u32 %v1100_v3, 16  ;;  %v1121_v33 = vld [vmem:[%s1242_s17 + $0x58] sm:$0x1] }
  0x20   : > { %v302_v18 = vsel %vm1255_vm2, %v297_v8, %v301_v55  ;;  %v209_v19 = vrot.slane %v208_v9, 4  ;;  %v438_v20 = vor.u32 %v437_v10, %v434_v5  ;;  %v356_v21 = vrot.slane %v354_v11, 5  ;;  %v1109_v38 = vld [vmem:[%s1242_s17 + $0x48] sm:$0xf]  ;;  %v1110_v43 = vld [vmem:[%s1242_s17 + $0x4c] sm:$0x1] }
  0x21   : > { %303 = vrot.lane.b32.xlu1 %v302_v18, %s1204_s19  ;;  %v362_v23 = vrot.slane %v360_v15, 5  ;;  %v616_v24 = vrot.slane %v614_v16, 4  ;;  %v617_v25 = vshll.u32 %v1100_v3, 16  ;;  %v623_v26 = vshll.u32 %v1101_v12, 16  ;;  %v1058_v48 = vld [vmem:[%s1242_s17 + $0x10] sm:$0xe] }
  0x22   : > { %v214_v29 = vsel %vm1255_vm2, %v209_v19, %v213_v4  ;;  %v439_v30 = vrot.slane %v438_v20, 4  ;;  %v357_v31 = vor.u32 %v356_v21, %v353_v14  ;;  %v533_v32 = vshrl.u32 %v1089_v17, 16  ;;  %v1059_v53 = vld [vmem:[%s1242_s17 + $0x14] sm:$0x1]  ;;  %v220_v58 = vld [vmem:[%s1242_s17 + $0x4] sm:$0xe] }
  0x23   : > { %215 = vrot.lane.b32.xlu0 %v214_v29, %s1204_s19  ;;  %v619_v34 = vrot.slane %v617_v25, 5  ;;  %v625_v35 = vrot.slane %v623_v26, 5  ;;  %v536_v36 = vshll.u32 %v1089_v17, 16  ;;  %v542_v37 = vshll.u32 %v1090_v22, 16  ;;  %v1078_v62 = vld [vmem:[%s1242_s17 + $0x28] sm:$0xf] }
  0x24   : > { %v444_v39 = vsel %vm1255_vm2, %v439_v30, %v443_v13  ;;  %v358_v40 = vrot.slane %v357_v31, 4  ;;  %v535_v41 = vrot.slane %v533_v32, 4  ;;  %v756_v42 = vshrl.u32 %v1120_v28, 16  ;;  %v221_v3 = vld [vmem:[%s1242_s17 + $0x8] sm:$0x1] }
  0x25   : > { %445 = vrot.lane.b32.xlu1 %v444_v39, %s1203_s18  ;;  %v620_v44 = vor.u32 %v619_v34, %v616_v24  ;;  %v538_v45 = vrot.slane %v536_v36, 5  ;;  %v544_v46 = vrot.slane %v542_v37, 5  ;;  %v759_v47 = vshll.u32 %v1120_v28, 16  ;;  %v1079_v4 = vld [vmem:[%s1242_s17 + $0x2c] sm:$0x1] }
  0x26   : > { %v363_v49 = vsel %vm1255_vm2, %v358_v40, %v362_v23  ;;  %v758_v50 = vrot.slane %v756_v42, 4  ;;  %v765_v51 = vshll.u32 %v1121_v33, 16  ;;  %v675_v52 = vshrl.u32 %v1109_v38, 16  ;;  %v1067_v8 = vld [vmem:[%s1242_s17 + $0x1c] sm:$0xf] }
  0x27   : > { %364 = vrot.lane.b32.xlu0 %v363_v49, %s1203_s18  ;;  %v621_v54 = vrot.slane %v620_v44, 4  ;;  %v539_v55 = vor.u32 %v538_v45, %v535_v41  ;;  %v761_v56 = vrot.slane %v759_v47, 5  ;;  %v678_v57 = vshll.u32 %v1109_v38, 16  ;;  %v1068_v13 = vld [vmem:[%s1242_s17 + $0x20] sm:$0x1] }
  0x28   : > { %v767_v59 = vrot.slane %v765_v51, 5  ;;  %v677_v60 = vrot.slane %v675_v52, 4  ;;  %v684_v61 = vshll.u32 %v1110_v43, 16  ;;  %v1060_v6 = vrot.slane %v1058_v48, 9  ;;  %v1102_v19 = vld [vmem:[%s1242_s17 + $0x40] sm:$0xe] }
  0x29   : > { %v626_v63 = vsel %vm1255_vm2, %v621_v54, %v625_v35  ;;  %v540_v0 = vrot.slane %v539_v55, 4  ;;  %v762_v1 = vor.u32 %v761_v56, %v758_v50  ;;  %v680_v2 = vrot.slane %v678_v57, 5  ;;  %v1103_v24 = vld [vmem:[%s1242_s17 + $0x44] sm:$0x1]  ;;  %v1091_v29 = vld [vmem:[%s1242_s17 + $0x34] sm:$0xe] }
  0x2a   : > { %627 = vrot.lane.b32.xlu1 %v626_v63, %s1204_s19  ;;  %v686_v5 = vrot.slane %v684_v61, 5  ;;  %v313_v7 = vrot.slane %v1059_v53, 5  ;;  %v452_v12 = vshrl.u32 %v1078_v62, 16  ;;  %v1049_v15 = vrot.slane %v220_v58, 9  ;;  %v1122_v30 = vld [vmem:[%s1242_s17 + $0x58] sm:$0xf] }
  0x2b   : > { %v545_v9 = vsel %vm1255_vm2, %v540_v0, %v544_v46  ;;  %v763_v10 = vrot.slane %v762_v1, 4  ;;  %v681_v11 = vor.u32 %v680_v2, %v677_v60  ;;  %v229_v16 = vrot.slane %v221_v3, 5  ;;  %v1123_v35 = vld [vmem:[%s1242_s17 + $0x5c] sm:$0x1]  ;;  %v1111_v36 = vld [vmem:[%s1242_s17 + $0x4c] sm:$0xf] }
  0x2c   : > { %546 = vrot.lane.b32.xlu0 %v545_v9, %s1204_s19  ;;  %v455_v17 = vshll.u32 %v1078_v62, 16  ;;  %v461_v18 = vshll.u32 %v1079_v4, 16  ;;  %v454_v22 = vrot.slane %v452_v12, 4  ;;  %v371_v23 = vshrl.u32 %v1067_v8, 16  ;;  %v1092_v41 = vld [vmem:[%s1242_s17 + $0x38] sm:$0x1] }
  0x2d   : > { %v768_v20 = vsel %vm1255_vm2, %v763_v10, %v767_v59  ;;  %v682_v21 = vrot.slane %v681_v11, 4  ;;  %v374_v26 = vshll.u32 %v1067_v8, 16  ;;  %v380_v28 = vshll.u32 %v1068_v13, 16  ;;  %v1112_v46 = vld [vmem:[%s1242_s17 + $0x50] sm:$0x1] }
  0x2e   : > { %769 = vrot.lane.b32.xlu1 %v768_v20, %s1203_s18  ;;  %v457_v25 = vrot.slane %v455_v17, 5  ;;  %v314_v32 = vsel %vm1314_vm5, %v1060_v6, %v313_v7  ;;  %v463_v33 = vrot.slane %v461_v18, 5  ;;  %v373_v34 = vrot.slane %v371_v23, 4  ;;  %v1080_v51 = vld [vmem:[%s1242_s17 + $0x28] sm:$0xe] }
  0x2f   : > { %v687_v31 = vsel %vm1255_vm2, %v682_v21, %v686_v5  ;;  %v376_v38 = vrot.slane %v374_v26, 5  ;;  %v1104_v39 = vrot.slane %v1102_v19, 9  ;;  %v637_v40 = vrot.slane %v1103_v24, 5  ;;  %v1081_v56 = vld [vmem:[%s1242_s17 + $0x2c] sm:$0x1] }
  0x30   : > { %688 = vrot.lane.b32.xlu0 %v687_v31, %s1203_s18  ;;  %v458_v37 = vor.u32 %v457_v25, %v454_v22  ;;  %v230_v42 = vsel %vm1314_vm5, %v1049_v15, %v229_v16  ;;  %v382_v43 = vrot.slane %v380_v28, 5  ;;  %v776_v44 = vshrl.u32 %v1122_v30, 16  ;;  %v1069_v61 = vld [vmem:[%s1242_s17 + $0x1c] sm:$0xe]  ;;  %v1070_v62 = vld [vmem:[%s1242_s17 + $0x20] sm:$0x1] }
  0x31   : > { %v779_v45 = vshll.u32 %v1122_v30, 16  ;;  %v377_v48 = vor.u32 %v376_v38, %v373_v34  ;;  %v785_v49 = vshll.u32 %v1123_v35, 16  ;;  %v695_v50 = vshrl.u32 %v1111_v36, 16  ;;  %v1124_v3 = vld [vmem:[%s1242_s17 + $0x58] sm:$0xe] }
  0x32   : > { %315 = vrot.lane.b32.xlu1 %v314_v32, %s1205_s20  ;;  %v459_v47 = vrot.slane %v458_v37, 4  ;;  %v1093_v52 = vrot.slane %v1091_v29, 9  ;;  %v778_v53 = vrot.slane %v776_v44, 4  ;;  %v698_v55 = vshll.u32 %v1111_v36, 16  ;;  %v1125_v8 = vld [vmem:[%s1242_s17 + $0x5c] sm:$0x1] }
  0x33   : > { %v781_v54 = vrot.slane %v779_v45, 5  ;;  %v378_v58 = vrot.slane %v377_v48, 4  ;;  %v638_v59 = vsel %vm1314_vm5, %v1104_v39, %v637_v40  ;;  %v697_v60 = vrot.slane %v695_v50, 4  ;;  %v1353_v16 = vld [vmem:[%s1242_s17 + $0x4c] sm:$0xe] }
  0x34   : > { %231 = vrot.lane.b32.xlu0 %v230_v42, %s1205_s20  ;;  %v464_v57 = vsel %vm1255_vm2, %v459_v47, %v463_v33  ;;  %v556_v63 = vrot.slane %v1092_v41, 5  ;;  %v700_v1 = vrot.slane %v698_v55, 5  ;;  %v704_v2 = vshll.u32 %v1112_v46, 16  ;;  %v1062_v17 = vld [vmem:[%s1242_s17 + $0x18] sm:$0xf] }
  0x35   : > { %v782_v0 = vor.u32 %v781_v54, %v778_v53  ;;  %v383_v4 = vsel %vm1255_vm2, %v378_v58, %v382_v43  ;;  %v787_v5 = vrot.slane %v785_v49, 5  ;;  %v1082_v6 = vrot.slane %v1080_v51, 9  ;;  %v1359_v21 = vld [vmem:[%s1242_s17 + $0x50] sm:$0x1]  ;;  %v1063_v22 = vld [vmem:[%s1242_s17 + $0x1c] sm:$0x1] }
  0x36   : > { %465 = vrot.lane.b32.xlu1 %v464_v57, %s1204_s19  ;;  %v475_v7 = vrot.slane %v1081_v56, 5  ;;  %v701_v10 = vor.u32 %v700_v1, %v697_v60  ;;  %v1071_v11 = vrot.slane %v1069_v61, 9  ;;  %v394_v12 = vrot.slane %v1070_v62, 5  ;;  %v1051_v28 = vld [vmem:[%s1242_s17 + $0xc] sm:$0xf] }
  0x37   : > { %v783_v9 = vrot.slane %v782_v0, 4  ;;  %v706_v13 = vrot.slane %v704_v2, 5  ;;  %v1126_v15 = vrot.slane %v1124_v3, 9  ;;  %v557_v18 = vsel %vm1314_vm5, %v1093_v52, %v556_v63  ;;  %v1106_v33 = vld [vmem:[%s1242_s17 + $0x48] sm:$0xf] }
  0x38   : > { %384 = vrot.lane.b32.xlu0 %v383_v4, %s1204_s19  ;;  %v702_v19 = vrot.slane %v701_v10, 4  ;;  %v799_v20 = vrot.slane %v1125_v8, 5  ;;  %v329_v23 = vshrl.u32 %v1062_v17, 16  ;;  %v332_v24 = vshll.u32 %v1062_v17, 16  ;;  %v1061_v35 = vld [vmem:[%s1242_s17 + $0x18] sm:$0xf] }
  0x39   : > { %v788_v25 = vsel %vm1255_vm2, %v783_v9, %v787_v5  ;;  %v476_v26 = vsel %vm1314_vm5, %v1082_v6, %v475_v7  ;;  %v1371_v29 = vsel %vm1314_vm5, %v1071_v11, %v394_v12  ;;  %v1115_v30 = vrot.slane %v1353_v16, 9  ;;  %v1384_v37 = vld [vmem:[%s1242_s17 + $0x10] sm:$0x1]  ;;  %v1107_v38 = vld [vmem:[%s1242_s17 + $0x4c] sm:$0x1] }
  0x3a   : > { %639 = vrot.lane.b32.xlu1 %v638_v59, %s1205_s20  ;;  %v718_v31 = vrot.slane %v1359_v21, 5  ;;  %v338_v32 = vshll.u32 %v1063_v22, 16  ;;  %v707_v34 = vsel %vm1255_vm2, %v702_v19, %v706_v13  ;;  %v1381_v36 = vsel %vm1314_vm5, %v1126_v15, %v799_v20  ;;  %v1095_v45 = vld [vmem:[%s1242_s17 + $0x3c] sm:$0xf]  ;;  %v1096_v48 = vld [vmem:[%s1242_s17 + $0x40] sm:$0x1] }
  0x3b   : > { %v653_v39 = vshrl.u32 %v1106_v33, 16  ;;  %v656_v40 = vshll.u32 %v1106_v33, 16  ;;  %v1388_v41 = vrot.slane %v329_v23, 4  ;;  %v1390_v42 = vrot.slane %v332_v24, 5  ;;  %v1050_v51 = vld [vmem:[%s1242_s17 + $0xc] sm:$0xf] }
  0x3c   : > { %558 = vrot.lane.b32.xlu0 %v557_v18, %s1205_s20  ;;  %v247_v43 = vshrl.u32 %v1051_v28, 16  ;;  %v662_v44 = vshll.u32 %v1107_v38, 16  ;;  %v572_v49 = vshrl.u32 %v1095_v45, 16  ;;  %v575_v50 = vshll.u32 %v1095_v45, 16  ;;  %v1084_v60 = vld [vmem:[%s1242_s17 + $0x30] sm:$0xf] }
  0x3d   : > { %v655_v46 = vrot.slane %v653_v39, 4  ;;  %v658_v47 = vrot.slane %v656_v40, 5  ;;  %v1396_v52 = vrot.slane %v338_v32, 5  ;;  %v250_v53 = vshll.u32 %v1051_v28, 16  ;;  %v1085_v0 = vld [vmem:[%s1242_s17 + $0x34] sm:$0x1] }
  0x3e   : > { %789 = vrot.lane.b32.xlu1 %v788_v25, %s1204_s19  ;;  %v256_v54 = vshll.u32 %v1384_v37, 16  ;;  %v581_v55 = vshll.u32 %v1096_v48, 16  ;;  %v1399_v57 = vrot.slane %v662_v44, 5  ;;  %v574_v58 = vrot.slane %v572_v49, 4  ;;  %v1073_v6 = vld [vmem:[%s1242_s17 + $0x24] sm:$0xf] }
  0x3f   : > { %v659_v56 = vor.u32 %v658_v47, %v655_v46  ;;  %v577_v59 = vrot.slane %v575_v50, 5  ;;  %v335_v61 = vor.u32 %v1390_v42, %v1388_v41  ;;  %v1405_v62 = vrot.slane %v247_v43, 4  ;;  %v1074_v9 = vld [vmem:[%s1242_s17 + $0x28] sm:$0x1]  ;;  %v1128_v19 = vld [vmem:[%s1242_s17 + $0x60] sm:$0xf] }
  0x40   : > { %708 = vrot.lane.b32.xlu0 %v707_v34, %s1204_s19  ;;  %v1407_v63 = vrot.slane %v581_v55, 5  ;;  %v491_v1 = vshrl.u32 %v1084_v60, 16  ;;  %v494_v4 = vshll.u32 %v1084_v60, 16  ;;  %v500_v5 = vshll.u32 %v1085_v0, 16  ;;  %v1105_v12 = vld [vmem:[%s1242_s17 + $0x48] sm:$0xf] }
  0x41   : > { %v1410_v2 = vrot.slane %v659_v56, 4  ;;  %v578_v3 = vor.u32 %v577_v59, %v574_v58  ;;  %v252_v7 = vrot.slane %v250_v53, 5  ;;  %v410_v10 = vshrl.u32 %v1073_v6, 16  ;;  %v1129_v24 = vld [vmem:[%s1242_s17 + $0x64] sm:$0x1] }
  0x42   : > { %322 = vrot.lane.b32.xlu1 %v1061_v35, %s1206_s21  ;;  %v493_v8 = vrot.slane %v491_v1, 4  ;;  %v413_v11 = vshll.u32 %v1073_v6, 16  ;;  %v496_v17 = vrot.slane %v494_v4, 5  ;;  %v1422_v18 = vrot.slane %v500_v5, 5  ;;  %v1094_v28 = vld [vmem:[%s1242_s17 + $0x3c] sm:$0xf] }
  0x43   : > { %v665_v13 = vsel %vm1255_vm2, %v1410_v2, %v1399_v57  ;;  %v1420_v15 = vrot.slane %v578_v3, 4  ;;  %v412_v20 = vrot.slane %v410_v10, 4  ;;  %v419_v23 = vshll.u32 %v1074_v9, 16  ;;  %v1117_v38 = vld [vmem:[%s1242_s17 + $0x54] sm:$0xf]  ;;  %v1190_v10 = vld [vmem:[%s1597_s1 + $0x8] sm:$0xff]  }
  0x44   : > { %239 = vrot.lane.b32.xlu0 %v1050_v51, %s1206_s21  ;;  %v415_v22 = vrot.slane %v413_v11, 5  ;;  %v815_v25 = vshrl.u32 %v1128_v19, 16  ;;  %v497_v33 = vor.u32 %v496_v17, %v493_v8  ;;  %v818_v34 = vshll.u32 %v1128_v19, 16  ;;  %v1118_v39 = vld [vmem:[%s1242_s17 + $0x58] sm:$0x1]  ;;  %v1192_v11 = vld [vmem:[%s1597_s1] sm:$0xff]  }
  0x45   : > { %v584_v32 = vsel %vm1255_vm2, %v1420_v15, %v1407_v63  ;;  %v824_v35 = vshll.u32 %v1129_v24, 16  ;;  %v1436_v40 = vrot.slane %v419_v23, 5  ;;  %v734_v42 = vshrl.u32 %v1117_v38, 16  ;;  %v1086_v43 = vld [vmem:[%s1242_s17 + $0x30] sm:$0xf] }
  0x46   : > { %477 = vrot.lane.b32.xlu1 %v476_v26, %s1205_s20  ;;  %v416_v26 = vor.u32 %v415_v22, %v412_v20  ;;  %v817_v41 = vrot.slane %v815_v25, 4  ;;  %v253_v44 = vor.u32 %v252_v7, %v1405_v62  ;;  %v1440_v45 = vrot.slane %v497_v33, 4  ;;  %509 = vst.msk [vmem:[#allocation2 + $0x10] sm:$0xf] %vm173_vm6, %v1086_v43  ;;  %v172_v48 = vld [vmem:[%s1242_s17] sm:$0xf] }
  0x47   : > { %v820_v46 = vrot.slane %v818_v34, 5  ;;  %v737_v47 = vshll.u32 %v1117_v38, 16  ;;  %v736_v50 = vrot.slane %v734_v42, 4  ;;  %v743_v51 = vshll.u32 %v1118_v39, 16  ;;  %174 = vst.msk [vmem:[#allocation2] sm:$0xf] %vm173_vm6, %v172_v48 }
  0x48   : > { %396 = vrot.lane.b32.xlu0 %v1371_v29, %s1205_s20  ;;  %v336_v29 = vrot.slane %v335_v61, 4  ;;  %v1445_v49 = vrot.slane %v416_v26, 4  ;;  %v1097_v53 = vld [vmem:[%s1242_s17 + $0x3c] sm:$0xf]  ;;  %v503_v55 = vsel %vm1255_vm2, %v1440_v45, %v1422_v18  ;;  %v826_v58 = vrot.slane %v824_v35, 5 }
  0x49   : > { %v821_v56 = vor.u32 %v820_v46, %v817_v41  ;;  %v739_v59 = vrot.slane %v737_v47, 5  ;;  %590 = vst.msk [vmem:[#allocation2 + $0x14] sm:$0xf] %vm173_vm6, %v1097_v53  ;;  %v1053_v60 = vld [vmem:[%s1242_s17 + $0xc] sm:$0xf]  ;;  %v719_v62 = vsel %vm1314_vm5, %v1115_v30, %v718_v31  ;;  %v258_v0 = vrot.slane %v256_v54, 5 }
  0x4a   : > { %646 = vrot.lane.b32.xlu1 %v1105_v12, %s1206_s21  ;;  %v1075_v61 = vld [vmem:[%s1242_s17 + $0x24] sm:$0xf]  ;;  %v422_v1 = vsel %vm1255_vm2, %v1445_v49, %v1436_v40  ;;  %266 = vst.msk [vmem:[#allocation2 + $0x4] sm:$0xf] %vm173_vm6, %v1053_v60  ;;  %v1064_v3 = vld [vmem:[%s1242_s17 + $0x18] sm:$0xf]  ;;  %v341_v31 = vsel %vm1255_vm2, %v336_v29, %v1396_v52 }
  0x4b   : > { %428 = vst.msk [vmem:[#allocation2 + $0xc] sm:$0xf] %vm173_vm6, %v1075_v61  ;;  %v1119_v4 = vld [vmem:[%s1242_s17 + $0x54] sm:$0xf]  ;;  %v254_v21 = vrot.slane %v253_v44, 4  ;;  %v822_v5 = vrot.slane %v821_v56, 4  ;;  %v740_v16 = vor.u32 %v739_v59, %v736_v50 }
  0x4c   : > { %565 = vrot.lane.b32.xlu0 %v1094_v28, %s1206_s21  ;;  %v745_v14 = vrot.slane %v743_v51, 5  ;;  %347 = vst.msk [vmem:[#allocation2 + $0x8] sm:$0xf] %vm173_vm6, %v1064_v3  ;;  %752 = vst.msk [vmem:[#allocation2 + $0x1c] sm:$0xf] %vm173_vm6, %v1119_v4 }
  0x4d   : > { %v1108_v30 = vld [vmem:[%s1242_s17 + $0x48] sm:$0xf]  ;;  %v827_v37 = vsel %vm1255_vm2, %v822_v5, %v826_v58  ;;  %v741_v54 = vrot.slane %v740_v16, 4  ;;  %v259_v6 = vsel %vm1255_vm2, %v254_v21, %v258_v0  ;;  %v1083_v52 = vld [vmem:[%s1242_s17 + $0x30] sm:$0xf] }
  0x4e   : > { %801 = vrot.lane.b32.xlu1 %v1381_v36, %s1205_s20  ;;  %671 = vst.msk [vmem:[#allocation2 + $0x18] sm:$0xf] %vm173_vm6, %v1108_v30  ;;  %v1189_v36 = vld [vmem:[%s1597_s1 + $0x10] ss:$0 sps:$4 sm:$0x33]  }
  0x4f   : > { %v746_v7 = vsel %vm1255_vm2, %v741_v54, %v745_v14  ;;  %1172 = vmatprep.subr.msk.bf16.mxu0 %vm900_vm7, %v1189_v36  ;;  %v902_v8 = vsel %vm900_vm7, %v1189_v36, 0  ;;  %v1072_v9 = vld [vmem:[%s1242_s17 + $0x24] sm:$0xf]  ;;  %1173 = vmatprep.subr.msk.bf16.mxu1 %vm900_vm7, %v1189_v36  ;;  %v1127_v12 = vld [vmem:[%s1242_s17 + $0x60] sm:$0xf] }
  0x50   : > { %720 = vrot.lane.b32.xlu0 %v719_v62, %s1205_s20  ;;  %1153 = vmatpush3.bf16.msra.mxu0 %v902_v8  ;;  %v1116_v17 = vld [vmem:[%s1242_s17 + $0x54] sm:$0xf]  ;;  %v1130_v3 = vld [vmem:[%s1598_s2] ss:$0 sm:$0xff] }
  0x51   : > { %1169 = vmatpush3.bf16.msra.mxu1 %v902_v8  ;;  %1154 = vmatprep.subr.bf16.mxu0 %v1190_v10 }
  0x52   : > { %342 = vrot.lane.b32.xlu1 %v341_v31, %s1207_s22  ;;  %1167 = vmatprep.subr.bf16.mxu1 %v1190_v10 }
  0x54   : > { %260 = vrot.lane.b32.xlu0 %v259_v6, %s1207_s22  ;;  %1155 = vmatpush3.bf16.msra.mxu0 %v1190_v10 }
  0x55   : > { %1170 = vmatpush3.bf16.msra.mxu1 %v1190_v10  ;;  %1156 = vmatprep.subr.bf16.mxu0 %v1192_v11 }
  0x56   : > { %484 = vrot.lane.b32.xlu1 %v1083_v52, %s1206_s21  ;;  %1168 = vmatprep.subr.bf16.mxu1 %v1192_v11 }
  0x58   : > { %403 = vrot.lane.b32.xlu0 %v1072_v9, %s1206_s21  ;;  %1157 = vmatpush3.bf16.msra.mxu0 %v1192_v11 }
  0x59   : > { %1171 = vmatpush3.bf16.msra.mxu1 %v1192_v11 }
  0x5a   : > { %666 = vrot.lane.b32.xlu1 %v665_v13, %s1207_s22 }
  0x5c   : > { %585 = vrot.lane.b32.xlu0 %v584_v32, %s1207_s22 }
  0x5e   : > { %808 = vrot.lane.b32.xlu1 %v1127_v12, %s1206_s21 }
  0x60   : > { %727 = vrot.lane.b32.xlu0 %v1116_v17, %s1206_s21 }
  0x62   : > { %504 = vrot.lane.b32.xlu1 %v503_v55, %s1207_s22 }
  0x64   : > { %423 = vrot.lane.b32.xlu0 %v422_v1, %s1207_s22 }
  0x66   : > { %828 = vrot.lane.b32.xlu1 %v827_v37, %s1207_s22 }
  0x68   : > { %747 = vrot.lane.b32.xlu0 %v746_v7, %s1207_s22 }
  0x8b   : > { %v527_v27 = vpop.permute.xlu1 %526 }
  0x8c   : > { %529 = vst.msk [vmem:[#allocation2 + $0x10] sm:$0xf] %vm197_vm8, %v527_v27  ;;  %v195_v57 = vpop.permute.xlu0 %194 }
  0x8d   : > { %198 = vst.msk [vmem:[#allocation2] sm:$0xf] %vm197_vm8, %v195_v57 }
  0x8f   : > { %v608_v63 = vpop.permute.xlu1 %607 }
  0x90   : > { %610 = vst.msk [vmem:[#allocation2 + $0x14] sm:$0xf] %vm197_vm8, %v608_v63  ;;  %v284_v2 = vpop.permute.xlu0 %283 }
  0x91   : > { %286 = vst.msk [vmem:[#allocation2 + $0x4] sm:$0xf] %vm197_vm8, %v284_v2 }
  0x93   : > { %v304_v13 = vpop.permute.xlu1 %303 }
  0x94   : > { %306 = vst.msk [vmem:[#allocation2 + $0x4] sm:$0xf] %vm218_vm9, %v304_v13 }
  0x95   : > { %v216_v15 = vpop.permute.xlu0 %215 }
  0x96   : > { %219 = vst.msk [vmem:[#allocation2] sm:$0xf] %vm218_vm9, %v216_v15 }
  0x97   : > { %v446_v18 = vpop.permute.xlu1 %445 }
  0x98   : > { %448 = vst.msk [vmem:[#allocation2 + $0xc] sm:$0xf] %vm197_vm8, %v446_v18 }
  0x99   : > { %v365_v19 = vpop.permute.xlu0 %364 }
  0x9a   : > { %367 = vst.msk [vmem:[#allocation2 + $0x8] sm:$0xf] %vm197_vm8, %v365_v19 }
  0x9c   : > { %v628_v20 = vpop.permute.xlu1 %627 }
  0x9d   : > { %630 = vst.msk [vmem:[#allocation2 + $0x14] sm:$0xf] %vm218_vm9, %v628_v20 }
  0x9e   : > { %v547_v22 = vpop.permute.xlu0 %546 }
  0x9f   : > { %549 = vst.msk [vmem:[#allocation2 + $0x10] sm:$0xf] %vm218_vm9, %v547_v22 }
  0xa0   : > { %v770_v23 = vpop.permute.xlu1 %769 }
  0xa1   : > { %772 = vst.msk [vmem:[#allocation2 + $0x1c] sm:$0xf] %vm197_vm8, %v770_v23 }
  0xa2   : > { %v689_v24 = vpop.permute.xlu0 %688 }
  0xa3   : > { %691 = vst.msk [vmem:[#allocation2 + $0x18] sm:$0xf] %vm197_vm8, %v689_v24 }
  0xa4   : > { %v316_v25 = vpop.permute.xlu1 %315 }
  0xa5   : > { %318 = vst.msk [vmem:[#allocation2 + $0x4] sm:$0xf] %vm234_vm10, %v316_v25 }
  0xa6   : > { %v232_v28 = vpop.permute.xlu0 %231 }
  0xa7   : > { %235 = vst.msk [vmem:[#allocation2] sm:$0xf] %vm234_vm10, %v232_v28 }
  0xa8   : > { %v466_v32 = vpop.permute.xlu1 %465 }
  0xa9   : > { %468 = vst.msk [vmem:[#allocation2 + $0xc] sm:$0xf] %vm218_vm9, %v466_v32 }
  0xaa   : > { %v385_v33 = vpop.permute.xlu0 %384 }
  0xab   : > { %387 = vst.msk [vmem:[#allocation2 + $0x8] sm:$0xf] %vm218_vm9, %v385_v33 }
  0xac   : > { %v640_v34 = vpop.permute.xlu1 %639 }
  0xad   : > { %642 = vst.msk [vmem:[#allocation2 + $0x14] sm:$0xf] %vm234_vm10, %v640_v34 }
  0xae   : > { %v559_v35 = vpop.permute.xlu0 %558 }
  0xaf   : > { %561 = vst.msk [vmem:[#allocation2 + $0x10] sm:$0xf] %vm234_vm10, %v559_v35 }
  0xb0   : > { %v790_v38 = vpop.permute.xlu1 %789 }
  0xb1   : > { %792 = vst.msk [vmem:[#allocation2 + $0x1c] sm:$0xf] %vm218_vm9, %v790_v38 }
  0xb2   : > { %v709_v39 = vpop.permute.xlu0 %708 }
  0xb3   : > { %711 = vst.msk [vmem:[#allocation2 + $0x18] sm:$0xf] %vm218_vm9, %v709_v39 }
  0xb4   : > { %v323_v26 = vpop.permute.xlu1 %322 }
  0xb5   : > { %325 = vst.msk [vmem:[#allocation2 + $0x4] sm:$0xf] %vm242_vm11, %v323_v26 }
  0xb6   : > { %v240_v40 = vpop.permute.xlu0 %239 }
  0xb7   : > { %243 = vst.msk [vmem:[#allocation2] sm:$0xf] %vm242_vm11, %v240_v40 }
  0xb8   : > { %v478_v41 = vpop.permute.xlu1 %477 }
  0xb9   : > { %480 = vst.msk [vmem:[#allocation2 + $0xc] sm:$0xf] %vm234_vm10, %v478_v41 }
  0xba   : > { %v397_v42 = vpop.permute.xlu0 %396 }
  0xbb   : > { %399 = vst.msk [vmem:[#allocation2 + $0x8] sm:$0xf] %vm234_vm10, %v397_v42 }
  0xbc   : > { %v647_v43 = vpop.permute.xlu1 %646 }
  0xbd   : > { %649 = vst.msk [vmem:[#allocation2 + $0x14] sm:$0xf] %vm242_vm11, %v647_v43 }
  0xbe   : > { %v566_v44 = vpop.permute.xlu0 %565 }
  0xbf   : > { %568 = vst.msk [vmem:[#allocation2 + $0x10] sm:$0xf] %vm242_vm11, %v566_v44 }
  0xc0   : > { %v802_v45 = vpop.permute.xlu1 %801 }
  0xc1   : > { %804 = vst.msk [vmem:[#allocation2 + $0x1c] sm:$0xf] %vm234_vm10, %v802_v45 }
  0xc2   : > { %v721_v46 = vpop.permute.xlu0 %720 }
  0xc3   : > { %723 = vst.msk [vmem:[#allocation2 + $0x18] sm:$0xf] %vm234_vm10, %v721_v46 }
  0xc4   : > { %v343_v47 = vpop.permute.xlu1 %342 }
  0xc5   : > { %345 = vst.msk [vmem:[#allocation2 + $0x4] sm:$0xf] %vm263_vm12, %v343_v47 }
  0xc6   : > { %v261_v48 = vpop.permute.xlu0 %260 }
  0xc7   : > { %264 = vst.msk [vmem:[#allocation2] sm:$0xf] %vm263_vm12, %v261_v48 }
  0xc8   : > { %v485_v29 = vpop.permute.xlu1 %484 }
  0xc9   : > { %487 = vst.msk [vmem:[#allocation2 + $0xc] sm:$0xf] %vm242_vm11, %v485_v29 }
  0xca   : > { %v404_v49 = vpop.permute.xlu0 %403 }
  0xcb   : > { %406 = vst.msk [vmem:[#allocation2 + $0x8] sm:$0xf] %vm242_vm11, %v404_v49 }
  0xcc   : > { %v667_v50 = vpop.permute.xlu1 %666 }
  0xcd   : > { %669 = vst.msk [vmem:[#allocation2 + $0x14] sm:$0xf] %vm263_vm12, %v667_v50 }
  0xce   : > { %v586_v51 = vpop.permute.xlu0 %585  ;;  %v1188_v53 = vld [vmem:[#allocation2] sm:$0xff]  }
  0xcf   : > { %588 = vst.msk [vmem:[#allocation2 + $0x10] sm:$0xf] %vm263_vm12, %v586_v51  ;;  %1158 = vmatprep.mubr.msk.bf16.mxu0 %vm887_vm13, %v1188_v53 }
  0xd0   : > { %v809_v55 = vpop.permute.xlu1 %808 }
  0xd1   : > { %811 = vst.msk [vmem:[#allocation2 + $0x1c] sm:$0xf] %vm242_vm11, %v809_v55 }
  0xd2   : > { %v728_v56 = vpop.permute.xlu0 %727 }
  0xd3   : > { %730 = vst.msk [vmem:[#allocation2 + $0x18] sm:$0xf] %vm242_vm11, %v728_v56 }
  0xd4   : > { %v505_v58 = vpop.permute.xlu1 %504 }
  0xd5   : > { %507 = vst.msk [vmem:[#allocation2 + $0xc] sm:$0xf] %vm263_vm12, %v505_v58 }
  0xd6   : > { %v424_v59 = vpop.permute.xlu0 %423  ;;  %v1191_v60 = vld [vmem:[#allocation2 + $0x10] sm:$0xff]  }
  0xd7   : > { %426 = vst.msk [vmem:[#allocation2 + $0x8] sm:$0xf] %vm263_vm12, %v424_v59  ;;  %1162 = vmatprep.mubr.msk.bf16.mxu1 %vm887_vm13, %v1191_v60 }
  0xd8   : > { %v829_v61 = vpop.permute.xlu1 %828 }
  0xd9   : > { %831 = vst.msk [vmem:[#allocation2 + $0x1c] sm:$0xf] %vm263_vm12, %v829_v61 }
  0xda   : > { %v748_v62 = vpop.permute.xlu0 %747 }
  0xdb   : > { %750 = vst.msk [vmem:[#allocation2 + $0x18] sm:$0xf] %vm263_vm12, %v748_v62 }
  0xde   : > { %v1193_v0 = vld [vmem:[#allocation2 + $0x8] sm:$0xff]  }
  0xdf   : > { %1159 = vmatmul.mubr.msk.bf16.vlgmr.msra.gmra.mxu0 %vm887_vm13, %v1193_v0 }
  0xe2   : > { %v1194_v1 = vld [vmem:[#allocation2 + $0x18] sm:$0xff]  }
  0xe3   : > { %1163 = vmatmul.mubr.msk.bf16.vlgmr.msra.gmra.mxu1 %vm887_vm13, %v1194_v1 }
 0x19f   : > { %v1160_v4 = vpop.f32.mrf.mxu0 }
 0x1a0   : > { %v947_v21 = vadd.f32 %v1160_v4, %v1130_v3 }
 0x1a1   : > { %v938_v5 = vpop.f32.mrf.mxu0 }
 0x1a2   : > { %v971_v16 = vmax.f32 %v947_v21, 0.0  ;;  %v939_v14 = vadd.f32 %v1130_v3, %v938_v5 }
 0x1a3   : > { %v1161_v30 = vpop.f32.mrf.mxu0  ;;  %v1164_v31 = vpop.f32.mrf.mxu1 }
 0x1a4   : > { %980 = vst.msk [vmem:[%s1575_s7 + $0x10] sm:$0xff] %vm977_vm14, %v971_v16  ;;  %v969_v37 = vmax.f32 %v939_v14, 0.0  ;;  %v950_v54 = vadd.f32 %v1161_v30, %v1130_v3  ;;  %v963_v6 = vadd.f32 %v1164_v31, %v1130_v3 }
 0x1a5   : > { %v941_v7 = vpop.f32.mrf.mxu0  ;;  %v954_v36 = vpop.f32.mrf.mxu1 }
 0x1a6   : > { %978 = vst.msk [vmem:[%s1575_s7] sm:$0xff] %vm977_vm14, %v969_v37  ;;  %v972_v52 = vmax.f32 %v950_v54, 0.0  ;;  %v975_v8 = vmax.f32 %v963_v6, 0.0  ;;  %v942_v9 = vadd.f32 %v1130_v3, %v941_v7  ;;  %v955_v10 = vadd.f32 %v1130_v3, %v954_v36 }
 0x1a7   : > { %v1165_v11 = vpop.f32.mrf.mxu1 }
 0x1a8   : > { %981 = vst.msk [vmem:[%s1575_s7 + $0x18] sm:$0xff] %vm977_vm14, %v972_v52  ;;  %984 = vst.msk [vmem:[%s1575_s7 + $0x30] sm:$0xff] %vm977_vm14, %v975_v8  ;;  %v970_v12 = vmax.f32 %v942_v9, 0.0  ;;  %v973_v17 = vmax.f32 %v955_v10, 0.0  ;;  %v966_v27 = vadd.f32 %v1165_v11, %v1130_v3 }
 0x1a9   : > { %v957_v57 = vpop.f32.mrf.mxu1 }
 0x1aa   : > { %979 = vst.msk [vmem:[%s1575_s7 + $0x8] sm:$0xff] %vm977_vm14, %v970_v12  ;;  %982 = vst.msk [vmem:[%s1575_s7 + $0x20] sm:$0xff] %vm977_vm14, %v973_v17  ;;  %v976_v63 = vmax.f32 %v966_v27, 0.0  ;;  %v958_v2 = vadd.f32 %v1130_v3, %v957_v57 }
 0x1ac   : > { %985 = vst.msk [vmem:[%s1575_s7 + $0x38] sm:$0xff] %vm977_vm14, %v976_v63  ;;  %v974_v13 = vmax.f32 %v958_v2, 0.0 }
 0x1ae   : > { %983 = vst.msk [vmem:[%s1575_s7 + $0x28] sm:$0xff] %vm977_vm14, %v974_v13 }
 0x1af PF: > { %s13_s12 = sadd.s32 1, %s1201_s12  }
 0x1b0   : > { %p10_p4 = scmp.ge.s32.totalorder %s13_s12, 4  }
 0x1b2   :  { %12 = sbr.rel (!%p10_p4) target bundleno = 1 (0x1), region = 70 }

</bundles_post_ra>
